<compile_context>
chip_gen: v7x
topology: tpu7x:2x2x1
jax: 0.10.0
libtpu: 0.0.40
codegen_flags: <defaults>
</compile_context>

<pallas_src>
import functools
import math

import jax
import jax.numpy as jnp
from jax.experimental import pallas as pl
from jax.experimental.pallas import tpu as pltpu

LANE = 128  # TPU lane width; all padded dims are multiples of this.


def _round_up(v, m):
    return ((v + m - 1) // m) * m


# ----------------------------------------------------------------------------
# Single fused Pallas kernel: the whole GUNET forward, VMEM resident.
#   adj:  [NP, NP]  bf16   symmetrically-normalized adjacency (zero padded)
#   x:    [NP, FP]  bf16   node features (zero padded)
#   w*:   bf16 weights (pre-padded / pre-split for the skip concats)
#   b*:   f32 [1, C] biases
#   out:  [NP, OUTP] f32   sigmoid probabilities (padded; sliced by wrapper)
# ----------------------------------------------------------------------------
def _gunet_kernel(
    adj_ref, x_ref,
    w0_ref, w1_ref, w2_ref, w3_ref,
    wu0a_ref, wu0b_ref, wu1a_ref, wu1b_ref,
    wu2m_ref, wu2x_ref, wu2h_ref,
    b0_ref, b1_ref, b2_ref, b3_ref, bu0_ref, bu1_ref, bu2_ref,
    out_ref,
):
    a = adj_ref[...]          # bf16 [NP, NP]
    x = x_ref[...]            # bf16 [NP, FP]

    def mm(p, q):
        return jnp.dot(p, q, preferred_element_type=jnp.float32)

    def gcn(h_bf16, w_ref, b_ref, relu):
        # out = A_norm @ (H @ W) + b  ;  bf16 MXU inputs, f32 accum/epilogue.
        xw = mm(h_bf16, w_ref[...]).astype(jnp.bfloat16)
        o = mm(a, xw) + b_ref[...]
        if relu:
            o = jnp.maximum(o, 0.0)
        return o

    # ---------------- encoder (pool = identity, see TODO above) ----------------
    m0 = gcn(x, w0_ref, b0_ref, relu=True)                      # f32 [NP, H]
    m0b = m0.astype(jnp.bfloat16)
    m1b = gcn(m0b, w1_ref, b1_ref, relu=True).astype(jnp.bfloat16)
    m2b = gcn(m1b, w2_ref, b2_ref, relu=True).astype(jnp.bfloat16)
    hb = gcn(m2b, w3_ref, b3_ref, relu=False).astype(jnp.bfloat16)  # bottleneck

    # ---------------- decoder: concats folded into split-weight accumulation ---
    # up0: cat(m2, h) @ Wu0 == m2 @ Wu0[:H] + h @ Wu0[H:]
    xw = (mm(m2b, wu0a_ref[...]) + mm(hb, wu0b_ref[...])).astype(jnp.bfloat16)
    hb = jnp.maximum(mm(a, xw) + bu0_ref[...], 0.0).astype(jnp.bfloat16)

    # up1: cat(m1, h) @ Wu1
    xw = (mm(m1b, wu1a_ref[...]) + mm(hb, wu1b_ref[...])).astype(jnp.bfloat16)
    hb = jnp.maximum(mm(a, xw) + bu1_ref[...], 0.0).astype(jnp.bfloat16)

    # up2: cat(m0, x_in, h) @ Wu2 == m0@Wu2[:H] + x_in@Wu2[H:H+F] + h@Wu2[H+F:]
    xw = (mm(m0b, wu2m_ref[...]) + mm(x, wu2x_ref[...])
          + mm(hb, wu2h_ref[...])).astype(jnp.bfloat16)
    logits = mm(a, xw) + bu2_ref[...]
    out_ref[...] = jax.nn.sigmoid(logits)                        # f32 epilogue


# ----------------------------------------------------------------------------
# Forward wrapper: one pallas_call, everything VMEM resident.
# ----------------------------------------------------------------------------
@functools.partial(jax.jit, static_argnames=("num_nodes", "out_channels"))
def gunet_forward(adj_p, x, packed_params, *, num_nodes, out_channels):
    n_pad = adj_p.shape[0]
    f_pad = packed_params[0].shape[0]     # W0 is [FP, H]
    out_pad = packed_params[8].shape[1]   # Wu2m is [H, OUTP]

    x_p = jnp.zeros((n_pad, f_pad), jnp.bfloat16).at[: x.shape[0], : x.shape[1]].set(
        x.astype(jnp.bfloat16)
    )

    n_inputs = 2 + len(packed_params)
    out = pl.pallas_call(
        _gunet_kernel,
        out_shape=jax.ShapeDtypeStruct((n_pad, out_pad), jnp.float32),
        in_specs=[pl.BlockSpec(memory_space=pltpu.MemorySpace.VMEM)] * n_inputs,
        out_specs=pl.BlockSpec(memory_space=pltpu.MemorySpace.VMEM),
        compiler_params=pltpu.CompilerParams(vmem_limit_bytes=32 * 1024 * 1024),
    )(adj_p, x_p, *packed_params)
    return out[:num_nodes, :out_channels].reshape(-1)


# ----------------------------------------------------------------------------
# Graph preprocessing (done once): GCN "improved" normalization.
# ----------------------------------------------------------------------------
def build_norm_adj(edge_index, num_nodes):
    """edge_index: [E, 2] (src, dst).  Returns f32 [N, N] normalized adjacency."""
    src = edge_index[:, 0]
    dst = edge_index[:, 1]
    A = jnp.zeros((num_nodes, num_nodes), jnp.float32)
    A = A.at[dst, src].add(1.0)                                   # src -> dst
    A_hat = A + 2.0 * jnp.eye(num_nodes, dtype=jnp.float32)       # improved: 2*I
    deg = jnp.sum(A_hat, axis=1)
    d = jnp.where(deg > 0, 1.0 / jnp.sqrt(deg), 0.0)
    return d[:, None] * A_hat * d[None, :]


# ----------------------------------------------------------------------------
# Parameters: glorot-uniform (as GCNConv.reset_parameters), zero biases.
# ----------------------------------------------------------------------------
def _glorot(key, fan_in, fan_out):
    limit = math.sqrt(6.0 / (fan_in + fan_out))
    return jax.random.uniform(key, (fan_in, fan_out), jnp.float32, -limit, limit)


def init_gunet_params(key, features, labels, hidden=128, depth=3):
    out_channels = 1 if labels == 2 else labels
    params = {"down": [], "up": []}
    dims_down = [(features, hidden)] + [(hidden, hidden)] * depth
    dims_up = [(2 * hidden, hidden)] * (depth - 1) + [(2 * hidden + features, out_channels)]
    for fi, fo in dims_down:
        key, k1 = jax.random.split(key)
        params["down"].append((_glorot(k1, fi, fo), jnp.zeros((fo,), jnp.float32)))
    for fi, fo in dims_up:
        key, k1 = jax.random.split(key)
        params["up"].append((_glorot(k1, fi, fo), jnp.zeros((fo,), jnp.float32)))
    return params, out_channels


def pack_gunet_params(params, features, hidden, out_channels):
    """One-time pad / split / bf16-cast of all weights (order matches kernel args)."""
    H, F = hidden, features
    FP = _round_up(max(F, 1), LANE)
    OUTP = _round_up(max(out_channels, 1), LANE)

    def padw(w, rows, cols):
        out = jnp.zeros((rows, cols), jnp.bfloat16)
        return out.at[: w.shape[0], : w.shape[1]].set(w.astype(jnp.bfloat16))

    def padb(b, cols):
        out = jnp.zeros((1, cols), jnp.float32)
        return out.at[0, : b.shape[0]].set(b.astype(jnp.float32))

    (W0, b0), (W1, b1), (W2, b2), (W3, b3) = params["down"]
    (Wu0, bu0), (Wu1, bu1), (Wu2, bu2) = params["up"]

    weights = (
        padw(W0, FP, H),
        padw(W1, H, H), padw(W2, H, H), padw(W3, H, H),
        padw(Wu0[:H], H, H), padw(Wu0[H:], H, H),           # up0: skip | h
        padw(Wu1[:H], H, H), padw(Wu1[H:], H, H),           # up1: skip | h
        padw(Wu2[:H], H, OUTP),                             # up2: m0
        padw(Wu2[H:H + F], FP, OUTP),                       # up2: x_in
        padw(Wu2[H + F:], H, OUTP),                         # up2: h
    )
    biases = (
        padb(b0, H), padb(b1, H), padb(b2, H), padb(b3, H),
        padb(bu0, H), padb(bu1, H), padb(bu2, OUTP),
    )
    return weights + biases


# ----------------------------------------------------------------------------
# Pure-JAX f32 reference (identity pooling), for a numerical sanity check.
# ----------------------------------------------------------------------------
def gunet_reference(params, x, adj, depth=3):
    def gcn(h, W, b, act=None):
        out = adj @ (h @ W) + b
        return jnp.maximum(out, 0.0) if act == "relu" else out

    x_in = x
    memory = []
    h = x
    for i in range(depth):
        W, b = params["down"][i]
        h = gcn(h, W, b, "relu")
        memory.append(h)
    memory[0] = jnp.concatenate([memory[0], x_in], axis=-1)
    W, b = params["down"][depth]
    h = gcn(h, W, b)
    for i in range(depth):
        h = jnp.concatenate([memory.pop(), h], axis=-1)
        W, b = params["up"][i]
        h = gcn(h, W, b, "relu" if i < depth - 1 else None)
    return jax.nn.sigmoid(h).reshape(-1)


# ----------------------------------------------------------------------------
if __name__ == "__main__":
    key = jax.random.PRNGKey(0)
    features, labels, hidden = 4, 2, 128
    num_nodes = 64

    k_x, k_e, k_p = jax.random.split(key, 3)
    x = jax.random.normal(k_x, (num_nodes, features), jnp.float32)

    # simple deterministic graph: bidirectional ring + a few random chords
    idx = jnp.arange(num_nodes)
    ring_fwd = jnp.stack([idx, (idx + 1) % num_nodes], axis=1)
    ring_bwd = jnp.stack([(idx + 1) % num_nodes, idx], axis=1)
    chord_src = jax.random.randint(k_e, (16,), 0, num_nodes)
    chord_dst = (chord_src + 7) % num_nodes
    chords = jnp.stack([chord_src, chord_dst], axis=1)
    edge_index = jnp.concatenate([ring_fwd, ring_bwd, chords], axis=0).astype(jnp.int32)

    params, out_channels = init_gunet_params(k_p, features, labels, hidden=hidden)
    packed = pack_gunet_params(params, features, hidden, out_channels)

    adj = build_norm_adj(edge_index, num_nodes)               # f32 [N, N]
    n_pad = _round_up(num_nodes, LANE)
    adj_p = jnp.zeros((n_pad, n_pad), jnp.bfloat16).at[:num_nodes, :num_nodes].set(
        adj.astype(jnp.bfloat16)
    )

    out = gunet_forward(adj_p, x, packed,
                        num_nodes=num_nodes, out_channels=out_channels)
    out = jax.block_until_ready(out)

    assert out.shape == (num_nodes * out_channels,)
    assert bool(jnp.all((out >= 0.0) & (out <= 1.0)))

    ref = gunet_reference(params, x, adj)
    max_err = float(jnp.max(jnp.abs(out - ref)))
    assert max_err < 5e-2, f"kernel vs f32 reference max|diff| = {max_err}"
    print("KERNEL_OK")
</pallas_src>

<mosaic_0001>
module attributes {stable_mosaic.version = 11 : i64} {
  func.func @_gunet_kernel(%arg0: memref<128x128xbf16, #tpu.memory_space<vmem>>, %arg1: memref<128x128xbf16, #tpu.memory_space<vmem>>, %arg2: memref<128x128xbf16, #tpu.memory_space<vmem>>, %arg3: memref<128x128xbf16, #tpu.memory_space<vmem>>, %arg4: memref<128x128xbf16, #tpu.memory_space<vmem>>, %arg5: memref<128x128xbf16, #tpu.memory_space<vmem>>, %arg6: memref<128x128xbf16, #tpu.memory_space<vmem>>, %arg7: memref<128x128xbf16, #tpu.memory_space<vmem>>, %arg8: memref<128x128xbf16, #tpu.memory_space<vmem>>, %arg9: memref<128x128xbf16, #tpu.memory_space<vmem>>, %arg10: memref<128x128xbf16, #tpu.memory_space<vmem>>, %arg11: memref<128x128xbf16, #tpu.memory_space<vmem>>, %arg12: memref<128x128xbf16, #tpu.memory_space<vmem>>, %arg13: memref<1x128xf32, #tpu.memory_space<vmem>>, %arg14: memref<1x128xf32, #tpu.memory_space<vmem>>, %arg15: memref<1x128xf32, #tpu.memory_space<vmem>>, %arg16: memref<1x128xf32, #tpu.memory_space<vmem>>, %arg17: memref<1x128xf32, #tpu.memory_space<vmem>>, %arg18: memref<1x128xf32, #tpu.memory_space<vmem>>, %arg19: memref<1x128xf32, #tpu.memory_space<vmem>>, %arg20: memref<128x128xf32, #tpu.memory_space<vmem>>) attributes {dimension_semantics = [], scalar_prefetch = 0 : i64, scratch_operands = 0 : i64, tpu.core_type = #tpu.core_type<tc>} {
    %c0 = arith.constant 0 : index
    %c0_0 = arith.constant 0 : index
    %0 = vector.load %arg0[%c0, %c0_0] : memref<128x128xbf16, #tpu.memory_space<vmem>>, vector<128x128xbf16>
    %c0_1 = arith.constant 0 : index
    %c0_2 = arith.constant 0 : index
    %1 = vector.load %arg1[%c0_1, %c0_2] : memref<128x128xbf16, #tpu.memory_space<vmem>>, vector<128x128xbf16>
    %c0_3 = arith.constant 0 : index
    %c0_4 = arith.constant 0 : index
    %2 = vector.load %arg2[%c0_3, %c0_4] : memref<128x128xbf16, #tpu.memory_space<vmem>>, vector<128x128xbf16>
    %cst = arith.constant dense<0.000000e+00> : vector<128x128xf32>
    %3 = tpu.matmul %1, %2, %cst {dimension_numbers = #tpu.dot_dimension_numbers<[1], [0], [0], [1], [0, 0, 1, 1], [], []>} : vector<128x128xbf16>, vector<128x128xbf16>, vector<128x128xf32> -> vector<128x128xf32>
    %4 = arith.truncf %3 : vector<128x128xf32> to vector<128x128xbf16>
    %cst_5 = arith.constant dense<0.000000e+00> : vector<128x128xf32>
    %5 = tpu.matmul %0, %4, %cst_5 {dimension_numbers = #tpu.dot_dimension_numbers<[1], [0], [0], [1], [0, 0, 1, 1], [], []>} : vector<128x128xbf16>, vector<128x128xbf16>, vector<128x128xf32> -> vector<128x128xf32>
    %c0_6 = arith.constant 0 : index
    %c0_7 = arith.constant 0 : index
    %6 = vector.load %arg13[%c0_6, %c0_7] : memref<1x128xf32, #tpu.memory_space<vmem>>, vector<1x128xf32>
    %7 = vector.broadcast %6 : vector<1x128xf32> to vector<128x128xf32>
    %8 = arith.addf %5, %7 : vector<128x128xf32>
    %cst_8 = arith.constant 0.000000e+00 : f32
    %9 = vector.broadcast %cst_8 : f32 to vector<128x128xf32>
    %10 = arith.maximumf %8, %9 : vector<128x128xf32>
    %11 = arith.truncf %10 : vector<128x128xf32> to vector<128x128xbf16>
    %c0_9 = arith.constant 0 : index
    %c0_10 = arith.constant 0 : index
    %12 = vector.load %arg3[%c0_9, %c0_10] : memref<128x128xbf16, #tpu.memory_space<vmem>>, vector<128x128xbf16>
    %cst_11 = arith.constant dense<0.000000e+00> : vector<128x128xf32>
    %13 = tpu.matmul %11, %12, %cst_11 {dimension_numbers = #tpu.dot_dimension_numbers<[1], [0], [0], [1], [0, 0, 1, 1], [], []>} : vector<128x128xbf16>, vector<128x128xbf16>, vector<128x128xf32> -> vector<128x128xf32>
    %14 = arith.truncf %13 : vector<128x128xf32> to vector<128x128xbf16>
    %cst_12 = arith.constant dense<0.000000e+00> : vector<128x128xf32>
    %15 = tpu.matmul %0, %14, %cst_12 {dimension_numbers = #tpu.dot_dimension_numbers<[1], [0], [0], [1], [0, 0, 1, 1], [], []>} : vector<128x128xbf16>, vector<128x128xbf16>, vector<128x128xf32> -> vector<128x128xf32>
    %c0_13 = arith.constant 0 : index
    %c0_14 = arith.constant 0 : index
    %16 = vector.load %arg14[%c0_13, %c0_14] : memref<1x128xf32, #tpu.memory_space<vmem>>, vector<1x128xf32>
    %17 = vector.broadcast %16 : vector<1x128xf32> to vector<128x128xf32>
    %18 = arith.addf %15, %17 : vector<128x128xf32>
    %cst_15 = arith.constant 0.000000e+00 : f32
    %19 = vector.broadcast %cst_15 : f32 to vector<128x128xf32>
    %20 = arith.maximumf %18, %19 : vector<128x128xf32>
    %21 = arith.truncf %20 : vector<128x128xf32> to vector<128x128xbf16>
    %c0_16 = arith.constant 0 : index
    %c0_17 = arith.constant 0 : index
    %22 = vector.load %arg4[%c0_16, %c0_17] : memref<128x128xbf16, #tpu.memory_space<vmem>>, vector<128x128xbf16>
    %cst_18 = arith.constant dense<0.000000e+00> : vector<128x128xf32>
    %23 = tpu.matmul %21, %22, %cst_18 {dimension_numbers = #tpu.dot_dimension_numbers<[1], [0], [0], [1], [0, 0, 1, 1], [], []>} : vector<128x128xbf16>, vector<128x128xbf16>, vector<128x128xf32> -> vector<128x128xf32>
    %24 = arith.truncf %23 : vector<128x128xf32> to vector<128x128xbf16>
    %cst_19 = arith.constant dense<0.000000e+00> : vector<128x128xf32>
    %25 = tpu.matmul %0, %24, %cst_19 {dimension_numbers = #tpu.dot_dimension_numbers<[1], [0], [0], [1], [0, 0, 1, 1], [], []>} : vector<128x128xbf16>, vector<128x128xbf16>, vector<128x128xf32> -> vector<128x128xf32>
    %c0_20 = arith.constant 0 : index
    %c0_21 = arith.constant 0 : index
    %26 = vector.load %arg15[%c0_20, %c0_21] : memref<1x128xf32, #tpu.memory_space<vmem>>, vector<1x128xf32>
    %27 = vector.broadcast %26 : vector<1x128xf32> to vector<128x128xf32>
    %28 = arith.addf %25, %27 : vector<128x128xf32>
    %cst_22 = arith.constant 0.000000e+00 : f32
    %29 = vector.broadcast %cst_22 : f32 to vector<128x128xf32>
    %30 = arith.maximumf %28, %29 : vector<128x128xf32>
    %31 = arith.truncf %30 : vector<128x128xf32> to vector<128x128xbf16>
    %c0_23 = arith.constant 0 : index
    %c0_24 = arith.constant 0 : index
    %32 = vector.load %arg5[%c0_23, %c0_24] : memref<128x128xbf16, #tpu.memory_space<vmem>>, vector<128x128xbf16>
    %cst_25 = arith.constant dense<0.000000e+00> : vector<128x128xf32>
    %33 = tpu.matmul %31, %32, %cst_25 {dimension_numbers = #tpu.dot_dimension_numbers<[1], [0], [0], [1], [0, 0, 1, 1], [], []>} : vector<128x128xbf16>, vector<128x128xbf16>, vector<128x128xf32> -> vector<128x128xf32>
    %34 = arith.truncf %33 : vector<128x128xf32> to vector<128x128xbf16>
    %cst_26 = arith.constant dense<0.000000e+00> : vector<128x128xf32>
    %35 = tpu.matmul %0, %34, %cst_26 {dimension_numbers = #tpu.dot_dimension_numbers<[1], [0], [0], [1], [0, 0, 1, 1], [], []>} : vector<128x128xbf16>, vector<128x128xbf16>, vector<128x128xf32> -> vector<128x128xf32>
    %c0_27 = arith.constant 0 : index
    %c0_28 = arith.constant 0 : index
    %36 = vector.load %arg16[%c0_27, %c0_28] : memref<1x128xf32, #tpu.memory_space<vmem>>, vector<1x128xf32>
    %37 = vector.broadcast %36 : vector<1x128xf32> to vector<128x128xf32>
    %38 = arith.addf %35, %37 : vector<128x128xf32>
    %39 = arith.truncf %38 : vector<128x128xf32> to vector<128x128xbf16>
    %c0_29 = arith.constant 0 : index
    %c0_30 = arith.constant 0 : index
    %40 = vector.load %arg6[%c0_29, %c0_30] : memref<128x128xbf16, #tpu.memory_space<vmem>>, vector<128x128xbf16>
    %cst_31 = arith.constant dense<0.000000e+00> : vector<128x128xf32>
    %41 = tpu.matmul %31, %40, %cst_31 {dimension_numbers = #tpu.dot_dimension_numbers<[1], [0], [0], [1], [0, 0, 1, 1], [], []>} : vector<128x128xbf16>, vector<128x128xbf16>, vector<128x128xf32> -> vector<128x128xf32>
    %c0_32 = arith.constant 0 : index
    %c0_33 = arith.constant 0 : index
    %42 = vector.load %arg7[%c0_32, %c0_33] : memref<128x128xbf16, #tpu.memory_space<vmem>>, vector<128x128xbf16>
    %cst_34 = arith.constant dense<0.000000e+00> : vector<128x128xf32>
    %43 = tpu.matmul %39, %42, %cst_34 {dimension_numbers = #tpu.dot_dimension_numbers<[1], [0], [0], [1], [0, 0, 1, 1], [], []>} : vector<128x128xbf16>, vector<128x128xbf16>, vector<128x128xf32> -> vector<128x128xf32>
    %44 = arith.addf %41, %43 : vector<128x128xf32>
    %45 = arith.truncf %44 : vector<128x128xf32> to vector<128x128xbf16>
    %cst_35 = arith.constant dense<0.000000e+00> : vector<128x128xf32>
    %46 = tpu.matmul %0, %45, %cst_35 {dimension_numbers = #tpu.dot_dimension_numbers<[1], [0], [0], [1], [0, 0, 1, 1], [], []>} : vector<128x128xbf16>, vector<128x128xbf16>, vector<128x128xf32> -> vector<128x128xf32>
    %c0_36 = arith.constant 0 : index
    %c0_37 = arith.constant 0 : index
    %47 = vector.load %arg17[%c0_36, %c0_37] : memref<1x128xf32, #tpu.memory_space<vmem>>, vector<1x128xf32>
    %48 = vector.broadcast %47 : vector<1x128xf32> to vector<128x128xf32>
    %49 = arith.addf %46, %48 : vector<128x128xf32>
    %cst_38 = arith.constant 0.000000e+00 : f32
    %50 = vector.broadcast %cst_38 : f32 to vector<128x128xf32>
    %51 = arith.maximumf %49, %50 : vector<128x128xf32>
    %52 = arith.truncf %51 : vector<128x128xf32> to vector<128x128xbf16>
    %c0_39 = arith.constant 0 : index
    %c0_40 = arith.constant 0 : index
    %53 = vector.load %arg8[%c0_39, %c0_40] : memref<128x128xbf16, #tpu.memory_space<vmem>>, vector<128x128xbf16>
    %cst_41 = arith.constant dense<0.000000e+00> : vector<128x128xf32>
    %54 = tpu.matmul %21, %53, %cst_41 {dimension_numbers = #tpu.dot_dimension_numbers<[1], [0], [0], [1], [0, 0, 1, 1], [], []>} : vector<128x128xbf16>, vector<128x128xbf16>, vector<128x128xf32> -> vector<128x128xf32>
    %c0_42 = arith.constant 0 : index
    %c0_43 = arith.constant 0 : index
    %55 = vector.load %arg9[%c0_42, %c0_43] : memref<128x128xbf16, #tpu.memory_space<vmem>>, vector<128x128xbf16>
    %cst_44 = arith.constant dense<0.000000e+00> : vector<128x128xf32>
    %56 = tpu.matmul %52, %55, %cst_44 {dimension_numbers = #tpu.dot_dimension_numbers<[1], [0], [0], [1], [0, 0, 1, 1], [], []>} : vector<128x128xbf16>, vector<128x128xbf16>, vector<128x128xf32> -> vector<128x128xf32>
    %57 = arith.addf %54, %56 : vector<128x128xf32>
    %58 = arith.truncf %57 : vector<128x128xf32> to vector<128x128xbf16>
    %cst_45 = arith.constant dense<0.000000e+00> : vector<128x128xf32>
    %59 = tpu.matmul %0, %58, %cst_45 {dimension_numbers = #tpu.dot_dimension_numbers<[1], [0], [0], [1], [0, 0, 1, 1], [], []>} : vector<128x128xbf16>, vector<128x128xbf16>, vector<128x128xf32> -> vector<128x128xf32>
    %c0_46 = arith.constant 0 : index
    %c0_47 = arith.constant 0 : index
    %60 = vector.load %arg18[%c0_46, %c0_47] : memref<1x128xf32, #tpu.memory_space<vmem>>, vector<1x128xf32>
    %61 = vector.broadcast %60 : vector<1x128xf32> to vector<128x128xf32>
    %62 = arith.addf %59, %61 : vector<128x128xf32>
    %cst_48 = arith.constant 0.000000e+00 : f32
    %63 = vector.broadcast %cst_48 : f32 to vector<128x128xf32>
    %64 = arith.maximumf %62, %63 : vector<128x128xf32>
    %65 = arith.truncf %64 : vector<128x128xf32> to vector<128x128xbf16>
    %c0_49 = arith.constant 0 : index
    %c0_50 = arith.constant 0 : index
    %66 = vector.load %arg10[%c0_49, %c0_50] : memref<128x128xbf16, #tpu.memory_space<vmem>>, vector<128x128xbf16>
    %cst_51 = arith.constant dense<0.000000e+00> : vector<128x128xf32>
    %67 = tpu.matmul %11, %66, %cst_51 {dimension_numbers = #tpu.dot_dimension_numbers<[1], [0], [0], [1], [0, 0, 1, 1], [], []>} : vector<128x128xbf16>, vector<128x128xbf16>, vector<128x128xf32> -> vector<128x128xf32>
    %c0_52 = arith.constant 0 : index
    %c0_53 = arith.constant 0 : index
    %68 = vector.load %arg11[%c0_52, %c0_53] : memref<128x128xbf16, #tpu.memory_space<vmem>>, vector<128x128xbf16>
    %cst_54 = arith.constant dense<0.000000e+00> : vector<128x128xf32>
    %69 = tpu.matmul %1, %68, %cst_54 {dimension_numbers = #tpu.dot_dimension_numbers<[1], [0], [0], [1], [0, 0, 1, 1], [], []>} : vector<128x128xbf16>, vector<128x128xbf16>, vector<128x128xf32> -> vector<128x128xf32>
    %70 = arith.addf %67, %69 : vector<128x128xf32>
    %c0_55 = arith.constant 0 : index
    %c0_56 = arith.constant 0 : index
    %71 = vector.load %arg12[%c0_55, %c0_56] : memref<128x128xbf16, #tpu.memory_space<vmem>>, vector<128x128xbf16>
    %cst_57 = arith.constant dense<0.000000e+00> : vector<128x128xf32>
    %72 = tpu.matmul %65, %71, %cst_57 {dimension_numbers = #tpu.dot_dimension_numbers<[1], [0], [0], [1], [0, 0, 1, 1], [], []>} : vector<128x128xbf16>, vector<128x128xbf16>, vector<128x128xf32> -> vector<128x128xf32>
    %73 = arith.addf %70, %72 : vector<128x128xf32>
    %74 = arith.truncf %73 : vector<128x128xf32> to vector<128x128xbf16>
    %cst_58 = arith.constant dense<0.000000e+00> : vector<128x128xf32>
    %75 = tpu.matmul %0, %74, %cst_58 {dimension_numbers = #tpu.dot_dimension_numbers<[1], [0], [0], [1], [0, 0, 1, 1], [], []>} : vector<128x128xbf16>, vector<128x128xbf16>, vector<128x128xf32> -> vector<128x128xf32>
    %c0_59 = arith.constant 0 : index
    %c0_60 = arith.constant 0 : index
    %76 = vector.load %arg19[%c0_59, %c0_60] : memref<1x128xf32, #tpu.memory_space<vmem>>, vector<1x128xf32>
    %77 = vector.broadcast %76 : vector<1x128xf32> to vector<128x128xf32>
    %78 = arith.addf %75, %77 : vector<128x128xf32>
    %79 = arith.negf %78 : vector<128x128xf32>
    %80 = math.exp %79 : vector<128x128xf32>
    %cst_61 = arith.constant 1.000000e+00 : f32
    %81 = vector.broadcast %cst_61 : f32 to vector<128x128xf32>
    %82 = arith.addf %81, %80 : vector<128x128xf32>
    %83 = arith.divf %81, %82 : vector<128x128xf32>
    %c0_62 = arith.constant 0 : index
    %c0_63 = arith.constant 0 : index
    %84 = vector.load %arg20[%c0_62, %c0_63] : memref<128x128xf32, #tpu.memory_space<vmem>>, vector<128x128xf32>
    tpu.vector_store %arg20[%c0_62, %c0_63], %83 {strides = array<i32>} : memref<128x128xf32, #tpu.memory_space<vmem>>, vector<128x128xf32>,
    return
  }
}

</mosaic_0001>

<bundles_post_ra>
// kernel: gunet_forward.1
= control target key start
LH: loop header
LB: loop body
LE: loop exit
PB: predicated region body
PF: predicated region fallthrough
CT: control target
= control target key end

     0   :  { %s5345_s0 = inlined_call_operand.vmem [shape: bf16[128,128], index: 0, kind: input, shape index: {}]   ;;  %s5346_s1 = inlined_call_operand.vmem [shape: bf16[128,128], index: 1, kind: input, shape index: {}]   ;;  %s5347_s2 = inlined_call_operand.vmem [shape: bf16[128,128], index: 2, kind: input, shape index: {}]   ;;  %s5348_s3 = inlined_call_operand.hbm [shape: bf16[128,128], index: 3, kind: input, shape index: {}]   ;;  %s5349_s4 = inlined_call_operand.hbm [shape: bf16[128,128], index: 4, kind: input, shape index: {}]   ;;  %s5350_s5 = inlined_call_operand.hbm [shape: bf16[128,128], index: 5, kind: input, shape index: {}]   ;;  %s5351_s6 = inlined_call_operand.hbm [shape: bf16[128,128], index: 6, kind: input, shape index: {}]   ;;  %s5352_s7 = inlined_call_operand.hbm [shape: bf16[128,128], index: 7, kind: input, shape index: {}]   ;;  %s5353_s8 = inlined_call_operand.hbm [shape: bf16[128,128], index: 8, kind: input, shape index: {}]   ;;  %s5354_s9 = inlined_call_operand.hbm [shape: bf16[128,128], index: 9, kind: input, shape index: {}]   ;;  %s5355_s10 = inlined_call_operand.hbm [shape: bf16[128,128], index: 10, kind: input, shape index: {}]   ;;  %s5356_s11 = inlined_call_operand.hbm [shape: bf16[128,128], index: 11, kind: input, shape index: {}]   ;;  %s5357_s12 = inlined_call_operand.hbm [shape: bf16[128,128], index: 12, kind: input, shape index: {}]   ;;  %s5358_s13 = inlined_call_operand.vmem [shape: f32[1,128], index: 13, kind: input, shape index: {}]   ;;  %s5359_s14 = inlined_call_operand.vmem [shape: f32[1,128], index: 14, kind: input, shape index: {}]   ;;  %s5360_s15 = inlined_call_operand.vmem [shape: f32[1,128], index: 15, kind: input, shape index: {}]   ;;  %s5361_s16 = inlined_call_operand.vmem [shape: f32[1,128], index: 16, kind: input, shape index: {}]   ;;  %s5362_s17 = inlined_call_operand.vmem [shape: f32[1,128], index: 17, kind: input, shape index: {}]   ;;  %s5363_s18 = inlined_call_operand.vmem [shape: f32[1,128], index: 18, kind: input, shape index: {}]   ;;  %s5364_s19 = inlined_call_operand.vmem [shape: f32[1,128], index: 19, kind: input, shape index: {}]   ;;  %s5365_s20 = inlined_call_operand.vmem [shape: f32[128,128], index: 20, kind: output, shape index: {}]  }
   0x1   :  { %5372 = sst [smem:[#allocation24_spill]] %s5345_s0 }
   0x2   :  { %5373 = sst [smem:[#allocation25_spill]] %s5346_s1 }
   0x3   :  { %5374 = sst [smem:[#allocation26_spill]] %s5347_s2 }
   0x4   :  { %5375 = sst [smem:[#allocation27_spill]] %s5348_s3 }
   0x5   :  { %5376 = sst [smem:[#allocation28_spill]] %s5349_s4 }
   0x6   :  { %5377 = sst [smem:[#allocation29_spill]] %s5365_s20 }
   0x7   :  { %25 = vsyncpa [#allocation3], 0 }
   0x8   :  { %26 = vsyncpa [#allocation5], 0 }
   0x9   :  { %27 = vsyncpa [#allocation8], 0 }
   0xa   :  { %28 = vsyncpa [#allocation11], 0 }
   0xb   :  { %29 = vsyncpa [#allocation14], 0 }
   0xc   :  { %30 = vsyncpa [#allocation17], 0  ;;  %s4634_s1 = smov [#allocation4]   ;;  %s4635_s23 = smov [#allocation7]  }
   0xd   :  { %s54_s22 = sshll.u32 %s4634_s1, 4  ;;  %s78_s24 = sshll.u32 %s4635_s23, 4  ;;  %s55_s22 = int_to_ptr.vmem [resolvable:$true] %s54_s22  ;;  %s4751_s24 = int_to_ptr.vmem [resolvable:$true] %s78_s24 }
   0xe   :  { %s5378_s3 = sld [smem:[#allocation28_spill]] }
  0x14   :  { %s4402_s26 = scalar_lea.hbm %s5378_s3, 1024 }
  0x15   :  { %p4403_p0 = scmp.ne.s32.totalorder %s5378_s3, %s4402_s26  ;;  %p4406_p1 = scmp.lt.u32.totalorder %s4402_s26, %s5378_s3 }
  0x17   :  { %p4408_p2 = pnand %p4406_p1, %p4403_p0 }
  0x19   :  { %4411 = shalt.err (!%p4408_p2)
}
  0x1a   :  { %s4412_s30 = scalar_lea.vmem %s55_s22, 1024  ;;  %p4417_p4 = scmp.lt.s32.totalorder %s55_s22, %s55_s22 }
  0x1b   :  { %p4413_p3 = scmp.ne.s32.totalorder %s55_s22, %s4412_s30  ;;  %p4418_p5 = scmp.lt.s32.totalorder %s4412_s30, %s4412_s30 }
  0x1d   :  { %p4419_p6 = por %p4418_p5, %p4417_p4 }
  0x1f   :  { %p4420_p7 = pnand %p4419_p6, %p4413_p3 }
  0x21   :  { %4423 = shalt.err (!%p4420_p7)
}
  0x22   :  { %s4636_s0 = smov 64   ;;  %s4637_s21 = smov 4  }
  0x23   :  { %60 = dma.hbm_to_vmem [thread:$0]  %s5378_s3, 1024, %s55_s22, [#allocation5], %s4636_s0, %s4636_s0, %s4637_s21  }
  0x24   :  { %s4424_s26 = scalar_lea.hbm %s5351_s6, 1024 }
  0x25   :  { %p4425_p8 = scmp.ne.s32.totalorder %s5351_s6, %s4424_s26  ;;  %p4428_p9 = scmp.lt.u32.totalorder %s4424_s26, %s5351_s6 }
  0x27   :  { %p4430_p10 = pnand %p4428_p9, %p4425_p8 }
  0x29   :  { %4433 = shalt.err (!%p4430_p10)
}
  0x2a   :  { %s4434_s30 = scalar_lea.vmem %s4751_s24, 1024  ;;  %p4439_p12 = scmp.lt.s32.totalorder %s4751_s24, %s4751_s24 }
  0x2b   :  { %p4435_p11 = scmp.ne.s32.totalorder %s4751_s24, %s4434_s30  ;;  %p4440_p13 = scmp.lt.s32.totalorder %s4434_s30, %s4434_s30 }
  0x2d   :  { %p4441_p0 = por %p4440_p13, %p4439_p12 }
  0x2f   :  { %p4442_p1 = pnand %p4441_p0, %p4435_p11 }
  0x31   :  { %4445 = shalt.err (!%p4442_p1)
}
  0x32   :  { %84 = dma.hbm_to_vmem [thread:$0]  %s5351_s6, 1024, %s4751_s24, [#allocation8], %s4636_s0, %s4636_s0, %s4637_s21  }
  0x33   :  { %s4638_s1 = smov [#allocation10]   ;;  %s4639_s2 = smov [#allocation13]  }
  0x34   :  { %s102_s23 = sshll.u32 %s4638_s1, 4  ;;  %s126_s25 = sshll.u32 %s4639_s2, 4  ;;  %s103_s23 = int_to_ptr.vmem [resolvable:$true] %s102_s23  ;;  %s4788_s25 = int_to_ptr.vmem [resolvable:$true] %s126_s25 }
  0x35   :  { %s4446_s28 = scalar_lea.hbm %s5353_s8, 1024 }
  0x36   :  { %p4447_p2 = scmp.ne.s32.totalorder %s5353_s8, %s4446_s28  ;;  %p4450_p3 = scmp.lt.u32.totalorder %s4446_s28, %s5353_s8 }
  0x38   :  { %p4452_p4 = pnand %p4450_p3, %p4447_p2 }
  0x3a   :  { %4455 = shalt.err (!%p4452_p4)
}
  0x3b   :  { %s4456_s6 = scalar_lea.vmem %s103_s23, 1024  ;;  %p4461_p6 = scmp.lt.s32.totalorder %s103_s23, %s103_s23 }
  0x3c   :  { %p4457_p5 = scmp.ne.s32.totalorder %s103_s23, %s4456_s6  ;;  %p4462_p7 = scmp.lt.s32.totalorder %s4456_s6, %s4456_s6 }
  0x3e   :  { %p4463_p8 = por %p4462_p7, %p4461_p6 }
  0x40   :  { %p4464_p9 = pnand %p4463_p8, %p4457_p5 }
  0x42   :  { %4467 = shalt.err (!%p4464_p9)
}
  0x43   :  { %108 = dma.hbm_to_vmem [thread:$0]  %s5353_s8, 1024, %s103_s23, [#allocation11], %s4636_s0, %s4636_s0, %s4637_s21  }
  0x44   :  { %s4468_s20 = scalar_lea.hbm %s5355_s10, 1024 }
  0x45   :  { %p4469_p10 = scmp.ne.s32.totalorder %s5355_s10, %s4468_s20  ;;  %p4472_p11 = scmp.lt.u32.totalorder %s4468_s20, %s5355_s10 }
  0x47   :  { %p4474_p12 = pnand %p4472_p11, %p4469_p10 }
  0x49   :  { %4477 = shalt.err (!%p4474_p12)
}
  0x4a   :  { %s4478_s4 = scalar_lea.vmem %s4788_s25, 1024  ;;  %p4483_p0 = scmp.lt.s32.totalorder %s4788_s25, %s4788_s25 }
  0x4b   :  { %p4479_p13 = scmp.ne.s32.totalorder %s4788_s25, %s4478_s4  ;;  %p4484_p1 = scmp.lt.s32.totalorder %s4478_s4, %s4478_s4 }
  0x4d   :  { %p4485_p2 = por %p4484_p1, %p4483_p0 }
  0x4f   :  { %p4486_p3 = pnand %p4485_p2, %p4479_p13 }
  0x51   :  { %4489 = shalt.err (!%p4486_p3)
}
  0x52   :  { %132 = dma.hbm_to_vmem [thread:$0]  %s5355_s10, 1024, %s4788_s25, [#allocation14], %s4636_s0, %s4636_s0, %s4637_s21  }
  0x53   :  { %s4640_s29 = smov [#allocation2]   ;;  %s4641_s6 = smov [#allocation6]  }
  0x54   :  { %s42_s30 = sshll.u32 %s4640_s29, 4  ;;  %s66_s24 = sshll.u32 %s4641_s6, 4  ;;  %s43_s30 = int_to_ptr.vmem [resolvable:$true] %s42_s30  ;;  %s4825_s24 = int_to_ptr.vmem [resolvable:$true] %s66_s24 }
  0x55   :  { %s5379_s1 = sld [smem:[#allocation27_spill]] }
  0x5b   :  { %s4490_s20 = scalar_lea.hbm %s5379_s1, 1024 }
  0x5c   :  { %p4491_p4 = scmp.ne.s32.totalorder %s5379_s1, %s4490_s20  ;;  %p4494_p5 = scmp.lt.u32.totalorder %s4490_s20, %s5379_s1 }
  0x5e   :  { %p4496_p6 = pnand %p4494_p5, %p4491_p4 }
  0x60   :  { %4499 = shalt.err (!%p4496_p6)
}
  0x61   :  { %s4500_s10 = scalar_lea.vmem %s43_s30, 1024  ;;  %p4505_p8 = scmp.lt.s32.totalorder %s43_s30, %s43_s30 }
  0x62   :  { %p4501_p7 = scmp.ne.s32.totalorder %s43_s30, %s4500_s10  ;;  %p4506_p9 = scmp.lt.s32.totalorder %s4500_s10, %s4500_s10 }
  0x64   :  { %p4507_p10 = por %p4506_p9, %p4505_p8 }
  0x66   :  { %p4508_p11 = pnand %p4507_p10, %p4501_p7 }
  0x68   :  { %4511 = shalt.err (!%p4508_p11)
}
  0x69   :  { %48 = dma.hbm_to_vmem [thread:$0]  %s5379_s1, 1024, %s43_s30, [#allocation3], %s4636_s0, %s4636_s0, %s4637_s21  }
  0x6a   :  { %s4512_s29 = scalar_lea.hbm %s5350_s5, 1024 }
  0x6b   :  { %p4513_p12 = scmp.ne.s32.totalorder %s5350_s5, %s4512_s29  ;;  %p4516_p13 = scmp.lt.u32.totalorder %s4512_s29, %s5350_s5 }
  0x6d   :  { %p4518_p0 = pnand %p4516_p13, %p4513_p12 }
  0x6f   :  { %4521 = shalt.err (!%p4518_p0)
}
  0x70   :  { %s4522_s2 = scalar_lea.vmem %s4825_s24, 1024  ;;  %p4527_p2 = scmp.lt.s32.totalorder %s4825_s24, %s4825_s24 }
  0x71   :  { %p4523_p1 = scmp.ne.s32.totalorder %s4825_s24, %s4522_s2  ;;  %p4528_p3 = scmp.lt.s32.totalorder %s4522_s2, %s4522_s2 }
  0x73   :  { %p4529_p4 = por %p4528_p3, %p4527_p2 }
  0x75   :  { %p4530_p5 = pnand %p4529_p4, %p4523_p1 }
  0x77   :  { %4533 = shalt.err (!%p4530_p5)
}
  0x78   :  { %72 = dma.hbm_to_vmem [thread:$0]  %s5350_s5, 1024, %s4825_s24, [#allocation5], %s4636_s0, %s4636_s0, %s4637_s21  }
  0x79   :  { %s4642_s26 = smov [#allocation9]   ;;  %s4643_s28 = smov [#allocation12]  }
  0x7a   :  { %s90_s27 = sshll.u32 %s4642_s26, 4  ;;  %s114_s10 = sshll.u32 %s4643_s28, 4  ;;  %s91_s27 = int_to_ptr.vmem [resolvable:$true] %s90_s27  ;;  %s4862_s10 = int_to_ptr.vmem [resolvable:$true] %s114_s10 }
  0x7b   :  { %s4534_s8 = scalar_lea.hbm %s5352_s7, 1024 }
  0x7c   :  { %p4535_p6 = scmp.ne.s32.totalorder %s5352_s7, %s4534_s8  ;;  %p4538_p7 = scmp.lt.u32.totalorder %s4534_s8, %s5352_s7 }
  0x7e   :  { %p4540_p8 = pnand %p4538_p7, %p4535_p6 }
  0x80   :  { %4543 = shalt.err (!%p4540_p8)
}
  0x81   :  { %s4544_s5 = scalar_lea.vmem %s91_s27, 1024  ;;  %p4549_p10 = scmp.lt.s32.totalorder %s91_s27, %s91_s27 }
  0x82   :  { %p4545_p9 = scmp.ne.s32.totalorder %s91_s27, %s4544_s5  ;;  %p4550_p11 = scmp.lt.s32.totalorder %s4544_s5, %s4544_s5 }
  0x84   :  { %p4551_p12 = por %p4550_p11, %p4549_p10 }
  0x86   :  { %p4552_p13 = pnand %p4551_p12, %p4545_p9 }
  0x88   :  { %4555 = shalt.err (!%p4552_p13)
}
  0x89   :  { %96 = dma.hbm_to_vmem [thread:$0]  %s5352_s7, 1024, %s91_s27, [#allocation8], %s4636_s0, %s4636_s0, %s4637_s21  }
  0x8a   :  { %s4556_s30 = scalar_lea.hbm %s5354_s9, 1024 }
  0x8b   :  { %p4557_p0 = scmp.ne.s32.totalorder %s5354_s9, %s4556_s30  ;;  %p4560_p1 = scmp.lt.u32.totalorder %s4556_s30, %s5354_s9 }
  0x8d   :  { %p4562_p2 = pnand %p4560_p1, %p4557_p0 }
  0x8f   :  { %4565 = shalt.err (!%p4562_p2)
}
  0x90   :  { %s4566_s4 = scalar_lea.vmem %s4862_s10, 1024  ;;  %p4571_p4 = scmp.lt.s32.totalorder %s4862_s10, %s4862_s10 }
  0x91   :  { %p4567_p3 = scmp.ne.s32.totalorder %s4862_s10, %s4566_s4  ;;  %p4572_p5 = scmp.lt.s32.totalorder %s4566_s4, %s4566_s4 }
  0x93   :  { %p4573_p6 = por %p4572_p5, %p4571_p4 }
  0x95   :  { %p4574_p7 = pnand %p4573_p6, %p4567_p3 }
  0x97   :  { %4577 = shalt.err (!%p4574_p7)
}
  0x98   :  { %120 = dma.hbm_to_vmem [thread:$0]  %s5354_s9, 1024, %s4862_s10, [#allocation11], %s4636_s0, %s4636_s0, %s4637_s21  }
  0x99   :  { %s4644_s8 = smov [#allocation15]   ;;  %s4645_s29 = smov [#allocation16]  }
  0x9a   :  { %s138_s23 = sshll.u32 %s4644_s8, 4  ;;  %s150_s6 = sshll.u32 %s4645_s29, 4  ;;  %s139_s23 = int_to_ptr.vmem [resolvable:$true] %s138_s23  ;;  %s4899_s6 = int_to_ptr.vmem [resolvable:$true] %s150_s6 }
  0x9b   :  { %s4578_s24 = scalar_lea.hbm %s5356_s11, 1024 }
  0x9c   :  { %p4579_p8 = scmp.ne.s32.totalorder %s5356_s11, %s4578_s24  ;;  %p4582_p9 = scmp.lt.u32.totalorder %s4578_s24, %s5356_s11 }
  0x9e   :  { %p4584_p10 = pnand %p4582_p9, %p4579_p8 }
  0xa0   :  { %4587 = shalt.err (!%p4584_p10)
}
  0xa1   :  { %s4588_s9 = scalar_lea.vmem %s139_s23, 1024  ;;  %p4593_p12 = scmp.lt.s32.totalorder %s139_s23, %s139_s23 }
  0xa2   :  { %p4589_p11 = scmp.ne.s32.totalorder %s139_s23, %s4588_s9  ;;  %p4594_p13 = scmp.lt.s32.totalorder %s4588_s9, %s4588_s9 }
  0xa4   :  { %p4595_p0 = por %p4594_p13, %p4593_p12 }
  0xa6   :  { %p4596_p1 = pnand %p4595_p0, %p4589_p11 }
  0xa8   :  { %4599 = shalt.err (!%p4596_p1)
}
  0xa9   :  { %144 = dma.hbm_to_vmem [thread:$0]  %s5356_s11, 1024, %s139_s23, [#allocation14], %s4636_s0, %s4636_s0, %s4637_s21  }
  0xaa   :  { %s4600_s25 = scalar_lea.hbm %s5357_s12, 1024 }
  0xab   :  { %p4601_p2 = scmp.ne.s32.totalorder %s5357_s12, %s4600_s25  ;;  %p4604_p3 = scmp.lt.u32.totalorder %s4600_s25, %s5357_s12 }
  0xad   :  { %p4606_p4 = pnand %p4604_p3, %p4601_p2 }
  0xaf   :  { %4609 = shalt.err (!%p4606_p4)
}
  0xb0   :  { %s4610_s29 = scalar_lea.vmem %s4899_s6, 1024  ;;  %p4615_p6 = scmp.lt.s32.totalorder %s4899_s6, %s4899_s6 }
  0xb1   :  { %p4611_p5 = scmp.ne.s32.totalorder %s4899_s6, %s4610_s29  ;;  %p4616_p7 = scmp.lt.s32.totalorder %s4610_s29, %s4610_s29 }
  0xb3   :  { %p4617_p8 = por %p4616_p7, %p4615_p6 }
  0xb5   :  { %p4618_p9 = pnand %p4617_p8, %p4611_p5 }
  0xb7   :  { %4621 = shalt.err (!%p4618_p9)
}
  0xb8   :  { %156 = dma.hbm_to_vmem [thread:$0]  %s5357_s12, 1024, %s4899_s6, [#allocation17], %s4636_s0, %s4636_s0, %s4637_s21  }
  0xb9   :  { %4622 = dma.done.wait [#allocation3], 1024  }
  0xba   :  { %4623 = vsyncadd [#allocation3], 4294966272 }
  0xbb   :  { %4624 = dma.done.wait [#allocation5], 2048  }
  0xbc   :  { %4625 = vsyncadd [#allocation5], 4294965248 }
  0xbd   :  { %4626 = dma.done.wait [#allocation8], 2048  }
  0xbe   :  { %4627 = vsyncadd [#allocation8], 4294965248 }
  0xbf   :  { %4628 = dma.done.wait [#allocation11], 2048  }
  0xc0   :  { %4629 = vsyncadd [#allocation11], 4294965248 }
  0xc1   :  { %4630 = dma.done.wait [#allocation14], 2048  }
  0xc2   :  { %4631 = vsyncadd [#allocation14], 4294965248 }
  0xc3   :  { %4632 = dma.done.wait [#allocation17], 1024  }
  0xc4   :  { %4633 = vsyncadd [#allocation17], 4294966272  ;;  %s5380_s24 = sld [smem:[#allocation26_spill]]  ;;  %s5381_s9 = sld [smem:[#allocation25_spill]]  ;;  %v4242_v17 = vld [vmem:[#allocation2] sm:$0xff]   ;;  %v4243_v18 = vld [vmem:[#allocation2 + $0x8] sm:$0xff]  }
  0xc5   :  { %s5382_s1 = sld [smem:[#allocation24_spill]]  ;;  %3630 = vmatprep.subr.bf16.mxu0 %v4242_v17  ;;  %v4244_v19 = vld [vmem:[#allocation2 + $0x10] sm:$0xff]   ;;  %v4245_v20 = vld [vmem:[#allocation2 + $0x18] sm:$0xff]   ;;  %v4246_v21 = vld [vmem:[#allocation2 + $0x20] sm:$0xff]   ;;  %s5383_s27 = sld [smem:[#allocation29_spill]] }
  0xc6   :  { %3631 = vmatpush3.bf16.msra.mxu0 %v4242_v17  ;;  %v4247_v22 = vld [vmem:[#allocation2 + $0x28] sm:$0xff]   ;;  %v4248_v54 = vld [vmem:[#allocation2 + $0x30] sm:$0xff]   ;;  %v4249_v55 = vld [vmem:[#allocation2 + $0x38] sm:$0xff]  }
  0xc7   :  { %3632 = vmatprep.subr.bf16.mxu0 %v4243_v18  ;;  %v3167_v56 = vld [vmem:[%s5358_s13] ss:$0 sm:$0xff] }
  0xca   :  { %v4218_v0 = vld [vmem:[%s5380_s24] sm:$0xff]   ;;  %v4219_v1 = vld [vmem:[%s5380_s24 + $0x8] sm:$0xff]   ;;  %v4220_v2 = vld [vmem:[%s5380_s24 + $0x10] sm:$0xff]   ;;  %3633 = vmatpush3.bf16.msra.mxu0 %v4243_v18 }
  0xcb   :  { %3566 = vmatprep.subr.bf16.mxu1 %v4218_v0  ;;  %v4221_v3 = vld [vmem:[%s5380_s24 + $0x18] sm:$0xff]   ;;  %v4226_v4 = vld [vmem:[%s5381_s9] sm:$0xff]   ;;  %v4223_v6 = vld [vmem:[%s5380_s24 + $0x28] sm:$0xff]   ;;  %3634 = vmatprep.subr.bf16.mxu0 %v4244_v19 }
  0xcc   :  { %3567 = vmatpush3.bf16.msra.mxu1 %v4218_v0  ;;  %3582 = vmatprep.mubr.bf16.mxu1 %v4226_v4  ;;  %v4222_v5 = vld [vmem:[%s5380_s24 + $0x20] sm:$0xff]   ;;  %v4224_v7 = vld [vmem:[%s5380_s24 + $0x30] sm:$0xff]   ;;  %v4225_v8 = vld [vmem:[%s5380_s24 + $0x38] sm:$0xff]  }
  0xcd   :  { %3568 = vmatprep.subr.bf16.mxu1 %v4219_v1  ;;  %v4227_v9 = vld [vmem:[%s5381_s9 + $0x8] sm:$0xff]   ;;  %v4228_v10 = vld [vmem:[%s5381_s9 + $0x10] sm:$0xff]   ;;  %v4229_v11 = vld [vmem:[%s5381_s9 + $0x18] sm:$0xff]  }
  0xce   :  { %v4230_v12 = vld [vmem:[%s5381_s9 + $0x20] sm:$0xff]   ;;  %v4231_v13 = vld [vmem:[%s5381_s9 + $0x28] sm:$0xff]   ;;  %v4232_v14 = vld [vmem:[%s5381_s9 + $0x30] sm:$0xff]   ;;  %3635 = vmatpush3.bf16.msra.mxu0 %v4244_v19 }
  0xcf   :  { %v4233_v15 = vld [vmem:[%s5381_s9 + $0x38] sm:$0xff]   ;;  %v4987_v16 = vld [vmem:[%s5382_s1] sm:$0xff]   ;;  %3636 = vmatprep.subr.bf16.mxu0 %v4245_v20  ;;  %v4993_v47 = vld [vmem:[%s5382_s1 + $0x8] sm:$0xff]  }
  0xd0   :  { %3569 = vmatpush3.bf16.msra.mxu1 %v4219_v1  ;;  %v4998_v48 = vld [vmem:[%s5382_s1 + $0x10] sm:$0xff]   ;;  %v5005_v49 = vld [vmem:[%s5382_s1 + $0x18] sm:$0xff]   ;;  %v5010_v50 = vld [vmem:[%s5382_s1 + $0x20] sm:$0xff]  }
  0xd1   :  { %3570 = vmatprep.subr.bf16.mxu1 %v4220_v2  ;;  %v5017_v51 = vld [vmem:[%s5382_s1 + $0x28] sm:$0xff]   ;;  %v5022_v52 = vld [vmem:[%s5382_s1 + $0x30] sm:$0xff]   ;;  %v5029_v53 = vld [vmem:[%s5382_s1 + $0x38] sm:$0xff]  }
  0xd2   :  { %3637 = vmatpush3.bf16.msra.mxu0 %v4245_v20 }
  0xd3   :  { %3638 = vmatprep.subr.bf16.mxu0 %v4246_v21 }
  0xd4   :  { %3571 = vmatpush3.bf16.msra.mxu1 %v4220_v2 }
  0xd5   :  { %3572 = vmatprep.subr.bf16.mxu1 %v4221_v3 }
  0xd6   :  { %3639 = vmatpush3.bf16.msra.mxu0 %v4246_v21 }
  0xd7   :  { %3640 = vmatprep.subr.bf16.mxu0 %v4247_v22 }
  0xd8   :  { %3573 = vmatpush3.bf16.msra.mxu1 %v4221_v3 }
  0xd9   :  { %3574 = vmatprep.subr.bf16.mxu1 %v4222_v5 }
  0xda   :  { %3641 = vmatpush3.bf16.msra.mxu0 %v4247_v22 }
  0xdb   :  { %3642 = vmatprep.subr.bf16.mxu0 %v4248_v54 }
  0xdc   :  { %3575 = vmatpush3.bf16.msra.mxu1 %v4222_v5 }
  0xdd   :  { %3576 = vmatprep.subr.bf16.mxu1 %v4223_v6 }
  0xde   :  { %3643 = vmatpush3.bf16.msra.mxu0 %v4248_v54 }
  0xdf   :  { %3644 = vmatprep.subr.bf16.mxu0 %v4249_v55 }
  0xe0   :  { %3577 = vmatpush3.bf16.msra.mxu1 %v4223_v6 }
  0xe1   :  { %3578 = vmatprep.subr.bf16.mxu1 %v4224_v7 }
  0xe2   :  { %3645 = vmatpush3.bf16.msra.mxu0 %v4249_v55 }
  0xe4   :  { %3579 = vmatpush3.bf16.msra.mxu1 %v4224_v7 }
  0xe5   :  { %3580 = vmatprep.subr.bf16.mxu1 %v4225_v8 }
  0xe8   :  { %3581 = vmatpush3.bf16.msra.mxu1 %v4225_v8 }
  0xeb   :  { %3583 = vmatmul.mubr.bf16.vlgmr.msra.gmra.mrb[0].mxu1 %v4227_v9 }
  0xec   :  { %3586 = vmatprep.mubr.bf16.mxu1 %v4228_v10 }
  0xf3   :  { %3587 = vmatmul.mubr.bf16.gmra.mrb[4].mxu1 %v4229_v11 }
  0xf4   :  { %3590 = vmatprep.mubr.bf16.mxu1 %v4230_v12 }
  0xfb   :  { %3591 = vmatmul.mubr.bf16.gmra.mrb[8].mxu1 %v4231_v13 }
  0xfc   :  { %3594 = vmatprep.mubr.bf16.mxu1 %v4232_v14 }
 0x103   :  { %3595 = vmatmul.mubr.bf16.gmra.mrb[12].mxu1 %v4233_v15 }
 0x104   :  { %3614 = vmatprep.mubr.bf16.mxu1 %v4987_v16 }
 0x1be   :  { %v3584_v23 = vpop.f32.mrb[0].mxu1 }
 0x1bf   :  { %v380_v24 = vpop.f32.mrb[1].mxu1 }
 0x1c0   :  { %v3585_v25 = vpop.f32.mrb[2].mxu1 }
 0x1c1   :  { %v444_v26 = vpack.c.bf16 %v3585_v25, %v3584_v23  ;;  %v383_v27 = vpop.f32.mrb[3].mxu1 }
 0x1c2   :  { %v443_v28 = vpack.c.bf16 %v383_v27, %v380_v24 }
 0x1c4   :  { %3598 = vmatprep.subr.bf16.mxu1 %v443_v28 }
 0x1c5   :  { %3599 = vmatpush3.bf16.msra.mxu1 %v443_v28 }
 0x1c6   :  { %v3588_v29 = vpop.f32.mrb[4].mxu1  ;;  %3600 = vmatprep.subr.bf16.mxu1 %v444_v26 }
 0x1c7   :  { %v396_v30 = vpop.f32.mrb[5].mxu1 }
 0x1c8   :  { %v3589_v31 = vpop.f32.mrb[6].mxu1 }
 0x1c9   :  { %v446_v32 = vpack.c.bf16 %v3589_v31, %v3588_v29  ;;  %v399_v33 = vpop.f32.mrb[7].mxu1  ;;  %3601 = vmatpush3.bf16.msra.mxu1 %v444_v26 }
 0x1ca   :  { %v445_v34 = vpack.c.bf16 %v399_v33, %v396_v30 }
 0x1cc   :  { %3602 = vmatprep.subr.bf16.mxu1 %v445_v34 }
 0x1cd   :  { %3603 = vmatpush3.bf16.msra.mxu1 %v445_v34 }
 0x1ce   :  { %v3592_v35 = vpop.f32.mrb[8].mxu1  ;;  %3604 = vmatprep.subr.bf16.mxu1 %v446_v32 }
 0x1cf   :  { %v412_v36 = vpop.f32.mrb[9].mxu1 }
 0x1d0   :  { %v3593_v37 = vpop.f32.mrb[10].mxu1 }
 0x1d1   :  { %v448_v38 = vpack.c.bf16 %v3593_v37, %v3592_v35  ;;  %v415_v39 = vpop.f32.mrb[11].mxu1  ;;  %3605 = vmatpush3.bf16.msra.mxu1 %v446_v32 }
 0x1d2   :  { %v447_v40 = vpack.c.bf16 %v415_v39, %v412_v36 }
 0x1d4   :  { %3606 = vmatprep.subr.bf16.mxu1 %v447_v40 }
 0x1d5   :  { %3607 = vmatpush3.bf16.msra.mxu1 %v447_v40 }
 0x1d6   :  { %v3596_v41 = vpop.f32.mrb[12].mxu1  ;;  %3608 = vmatprep.subr.bf16.mxu1 %v448_v38 }
 0x1d7   :  { %v428_v42 = vpop.f32.mrb[13].mxu1 }
 0x1d8   :  { %v3597_v43 = vpop.f32.mrb[14].mxu1 }
 0x1d9   :  { %v450_v44 = vpack.c.bf16 %v3597_v43, %v3596_v41  ;;  %v431_v45 = vpop.f32.mrb[15].mxu1  ;;  %3609 = vmatpush3.bf16.msra.mxu1 %v448_v38 }
 0x1da   :  { %v449_v46 = vpack.c.bf16 %v431_v45, %v428_v42 }
 0x1dc   :  { %3610 = vmatprep.subr.bf16.mxu1 %v449_v46 }
 0x1dd   :  { %3611 = vmatpush3.bf16.msra.mxu1 %v449_v46 }
 0x1de   :  { %3612 = vmatprep.subr.bf16.mxu1 %v450_v44 }
 0x1e1   :  { %3613 = vmatpush3.bf16.msra.mxu1 %v450_v44 }
 0x1e4   :  { %3615 = vmatmul.mubr.bf16.vlgmr.msra.gmra.mrb[16].mxu1 %v4993_v47 }
 0x1e5   :  { %3618 = vmatprep.mubr.bf16.mxu1 %v4998_v48 }
 0x1ec   :  { %3619 = vmatmul.mubr.bf16.gmra.mrb[20].mxu1 %v5005_v49 }
 0x1ed   :  { %3622 = vmatprep.mubr.bf16.mxu1 %v5010_v50 }
 0x1f4   :  { %3623 = vmatmul.mubr.bf16.gmra.mrb[24].mxu1 %v5017_v51 }
 0x1f5   :  { %3626 = vmatprep.mubr.bf16.mxu1 %v5022_v52 }
 0x1fc   :  { %3627 = vmatmul.mubr.bf16.gmra.mrb[28].mxu1 %v5029_v53 }
 0x1fd   :  { %3678 = vmatprep.mubr.bf16.mxu1 %v4987_v16 }
 0x2b7   :  { %v3616_v57 = vpop.f32.mrb[16].mxu1 }
 0x2b8   :  { %v549_v58 = vadd.f32 %v3616_v57, %v3167_v56  ;;  %v540_v59 = vpop.f32.mrb[17].mxu1 }
 0x2b9   :  { %v541_v60 = vadd.f32 %v3167_v56, %v540_v59  ;;  %v3617_v61 = vpop.f32.mrb[18].mxu1  ;;  %v4251_v59 = vld [vmem:[#allocation4 + $0x8] sm:$0xff]  }
 0x2ba   :  { %v552_v62 = vadd.f32 %v3617_v61, %v3167_v56  ;;  %v543_v63 = vpop.f32.mrb[19].mxu1  ;;  %v605_v1 = vmax.f32 %v549_v58, 0.0  ;;  %v4250_v58 = vld [vmem:[#allocation4] sm:$0xff]  }
 0x2bb   :  { %v544_v0 = vadd.f32 %v3167_v56, %v543_v63  ;;  %v603_v3 = vmax.f32 %v541_v60, 0.0  ;;  %3694 = vmatprep.subr.bf16.mxu0 %v4250_v58  ;;  %v4252_v60 = vld [vmem:[#allocation4 + $0x10] sm:$0xff]   ;;  %v4254_v61 = vld [vmem:[#allocation4 + $0x20] sm:$0xff]  }
 0x2bc   :  { %v606_v2 = vmax.f32 %v552_v62, 0.0  ;;  %v4255_v62 = vld [vmem:[#allocation4 + $0x28] sm:$0xff]  }
 0x2bd   :  { %v604_v4 = vmax.f32 %v544_v0, 0.0 }
 0x2be   :  { %v5036_v5 = vpack.c.bf16 %v606_v2, %v605_v1 }
 0x2bf   :  { %v3620_v6 = vpop.f32.mrb[20].mxu1  ;;  %v5038_v7 = vpack.c.bf16 %v604_v4, %v603_v3 }
 0x2c0   :  { %v565_v8 = vadd.f32 %v3620_v6, %v3167_v56  ;;  %v556_v9 = vpop.f32.mrb[21].mxu1 }
 0x2c1   :  { %v557_v10 = vadd.f32 %v3167_v56, %v556_v9  ;;  %v3621_v11 = vpop.f32.mrb[22].mxu1  ;;  %3646 = vmatprep.mubr.bf16.mxu0 %v5038_v7 }
 0x2c2   :  { %v568_v12 = vadd.f32 %v3621_v11, %v3167_v56  ;;  %v559_v13 = vpop.f32.mrb[23].mxu1  ;;  %3647 = vmatmul.mubr.bf16.vlgmr.msra.gmra.mrb[0].mxu0 %v5036_v5  ;;  %v609_v15 = vmax.f32 %v565_v8, 0.0 }
 0x2c3   :  { %v560_v14 = vadd.f32 %v3167_v56, %v559_v13  ;;  %v607_v18 = vmax.f32 %v557_v10, 0.0  ;;  %3695 = vmatpush3.bf16.msra.mxu0 %v4250_v58 }
 0x2c4   :  { %v610_v17 = vmax.f32 %v568_v12, 0.0  ;;  %3696 = vmatprep.subr.bf16.mxu0 %v4251_v59 }
 0x2c5   :  { %v608_v19 = vmax.f32 %v560_v14, 0.0 }
 0x2c6   :  { %v5042_v20 = vpack.c.bf16 %v610_v17, %v609_v15 }
 0x2c7   :  { %v5044_v21 = vpack.c.bf16 %v608_v19, %v607_v18  ;;  %v3624_v22 = vpop.f32.mrb[24].mxu1  ;;  %3697 = vmatpush3.bf16.msra.mxu0 %v4251_v59 }
 0x2c8   :  { %v581_v23 = vadd.f32 %v3624_v22, %v3167_v56  ;;  %v572_v24 = vpop.f32.mrb[25].mxu1  ;;  %3698 = vmatprep.subr.bf16.mxu0 %v4252_v60 }
 0x2c9   :  { %v573_v25 = vadd.f32 %v3167_v56, %v572_v24  ;;  %v3625_v26 = vpop.f32.mrb[26].mxu1  ;;  %3650 = vmatprep.mubr.bf16.mxu0 %v5044_v21 }
 0x2ca   :  { %v584_v27 = vadd.f32 %v3625_v26, %v3167_v56  ;;  %v575_v28 = vpop.f32.mrb[27].mxu1  ;;  %3651 = vmatmul.mubr.bf16.gmra.mrb[4].mxu0 %v5042_v20  ;;  %v613_v30 = vmax.f32 %v581_v23, 0.0 }
 0x2cb   :  { %v576_v29 = vadd.f32 %v3167_v56, %v575_v28  ;;  %v611_v32 = vmax.f32 %v573_v25, 0.0  ;;  %3699 = vmatpush3.bf16.msra.mxu0 %v4252_v60  ;;  %v4256_v28 = vld [vmem:[#allocation4 + $0x30] sm:$0xff]  }
 0x2cc   :  { %v614_v31 = vmax.f32 %v584_v27, 0.0 }
 0x2cd   :  { %v612_v33 = vmax.f32 %v576_v29, 0.0  ;;  %v4257_v29 = vld [vmem:[#allocation4 + $0x38] sm:$0xff]  }
 0x2ce   :  { %v5048_v34 = vpack.c.bf16 %v614_v31, %v613_v30  ;;  %v3184_v30 = vld [vmem:[%s5359_s14] ss:$0 sm:$0xff] }
 0x2cf   :  { %v5050_v35 = vpack.c.bf16 %v612_v33, %v611_v32  ;;  %v3628_v36 = vpop.f32.mrb[28].mxu1 }
 0x2d0   :  { %v597_v37 = vadd.f32 %v3628_v36, %v3167_v56  ;;  %v588_v38 = vpop.f32.mrb[29].mxu1 }
 0x2d1   :  { %v589_v39 = vadd.f32 %v3167_v56, %v588_v38  ;;  %v3629_v40 = vpop.f32.mrb[30].mxu1  ;;  %3654 = vmatprep.mubr.bf16.mxu0 %v5050_v35 }
 0x2d2   :  { %v600_v41 = vadd.f32 %v3629_v40, %v3167_v56  ;;  %v591_v42 = vpop.f32.mrb[31].mxu1  ;;  %3655 = vmatmul.mubr.bf16.gmra.mrb[8].mxu0 %v5048_v34  ;;  %v617_v44 = vmax.f32 %v597_v37, 0.0 }
 0x2d3   :  { %v592_v43 = vadd.f32 %v3167_v56, %v591_v42  ;;  %v615_v46 = vmax.f32 %v589_v39, 0.0  ;;  %v4253_v56 = vld [vmem:[#allocation4 + $0x18] sm:$0xff]  }
 0x2d4   :  { %v618_v45 = vmax.f32 %v600_v41, 0.0  ;;  %3700 = vmatprep.subr.bf16.mxu0 %v4253_v56 }
 0x2d5   :  { %v616_v54 = vmax.f32 %v592_v43, 0.0  ;;  %3701 = vmatpush3.bf16.msra.mxu0 %v4253_v56 }
 0x2d6   :  { %v5054_v55 = vpack.c.bf16 %v618_v45, %v617_v44  ;;  %3702 = vmatprep.subr.bf16.mxu0 %v4254_v61 }
 0x2d7   :  { %v5056_v57 = vpack.c.bf16 %v616_v54, %v615_v46 }
 0x2d9   :  { %3658 = vmatprep.mubr.bf16.mxu0 %v5056_v57  ;;  %3703 = vmatpush3.bf16.msra.mxu0 %v4254_v61 }
 0x2da   :  { %3659 = vmatmul.mubr.bf16.gmra.mrb[12].mxu0 %v5054_v55  ;;  %3704 = vmatprep.subr.bf16.mxu0 %v4255_v62 }
 0x2dd   :  { %3705 = vmatpush3.bf16.msra.mxu0 %v4255_v62 }
 0x2de   :  { %3706 = vmatprep.subr.bf16.mxu0 %v4256_v28 }
 0x2e1   :  { %3707 = vmatpush3.bf16.msra.mxu0 %v4256_v28 }
 0x2e2   :  { %3708 = vmatprep.subr.bf16.mxu0 %v4257_v29 }
 0x2e5   :  { %3709 = vmatpush3.bf16.msra.mxu0 %v4257_v29 }
 0x395   :  { %v3648_v63 = vpop.f32.mrb[0].mxu0 }
 0x396   :  { %v725_v0 = vpop.f32.mrb[1].mxu0 }
 0x397   :  { %v3649_v1 = vpop.f32.mrb[2].mxu0 }
 0x398   :  { %v789_v2 = vpack.c.bf16 %v3649_v1, %v3648_v63  ;;  %v728_v3 = vpop.f32.mrb[3].mxu0 }
 0x399   :  { %v788_v4 = vpack.c.bf16 %v728_v3, %v725_v0 }
 0x39b   :  { %3662 = vmatprep.subr.bf16.mxu1 %v788_v4 }
 0x39c   :  { %3663 = vmatpush3.bf16.msra.mxu1 %v788_v4 }
 0x39d   :  { %v3652_v6 = vpop.f32.mrb[4].mxu0  ;;  %3664 = vmatprep.subr.bf16.mxu1 %v789_v2 }
 0x39e   :  { %v741_v8 = vpop.f32.mrb[5].mxu0 }
 0x39f   :  { %v3653_v9 = vpop.f32.mrb[6].mxu0 }
 0x3a0   :  { %v791_v10 = vpack.c.bf16 %v3653_v9, %v3652_v6  ;;  %v744_v11 = vpop.f32.mrb[7].mxu0  ;;  %3665 = vmatpush3.bf16.msra.mxu1 %v789_v2 }
 0x3a1   :  { %v790_v12 = vpack.c.bf16 %v744_v11, %v741_v8 }
 0x3a3   :  { %3666 = vmatprep.subr.bf16.mxu1 %v790_v12 }
 0x3a4   :  { %3667 = vmatpush3.bf16.msra.mxu1 %v790_v12 }
 0x3a5   :  { %v3656_v13 = vpop.f32.mrb[8].mxu0  ;;  %3668 = vmatprep.subr.bf16.mxu1 %v791_v10 }
 0x3a6   :  { %v757_v14 = vpop.f32.mrb[9].mxu0 }
 0x3a7   :  { %v3657_v15 = vpop.f32.mrb[10].mxu0 }
 0x3a8   :  { %v793_v17 = vpack.c.bf16 %v3657_v15, %v3656_v13  ;;  %v760_v18 = vpop.f32.mrb[11].mxu0  ;;  %3669 = vmatpush3.bf16.msra.mxu1 %v791_v10 }
 0x3a9   :  { %v792_v19 = vpack.c.bf16 %v760_v18, %v757_v14 }
 0x3ab   :  { %3670 = vmatprep.subr.bf16.mxu1 %v792_v19 }
 0x3ac   :  { %3671 = vmatpush3.bf16.msra.mxu1 %v792_v19 }
 0x3ad   :  { %v3660_v22 = vpop.f32.mrb[12].mxu0  ;;  %3672 = vmatprep.subr.bf16.mxu1 %v793_v17 }
 0x3ae   :  { %v773_v23 = vpop.f32.mrb[13].mxu0 }
 0x3af   :  { %v3661_v24 = vpop.f32.mrb[14].mxu0 }
 0x3b0   :  { %v795_v25 = vpack.c.bf16 %v3661_v24, %v3660_v22  ;;  %v776_v26 = vpop.f32.mrb[15].mxu0  ;;  %3673 = vmatpush3.bf16.msra.mxu1 %v793_v17 }
 0x3b1   :  { %v794_v27 = vpack.c.bf16 %v776_v26, %v773_v23 }
 0x3b3   :  { %3674 = vmatprep.subr.bf16.mxu1 %v794_v27 }
 0x3b4   :  { %3675 = vmatpush3.bf16.msra.mxu1 %v794_v27 }
 0x3b5   :  { %3676 = vmatprep.subr.bf16.mxu1 %v795_v25 }
 0x3b8   :  { %3677 = vmatpush3.bf16.msra.mxu1 %v795_v25 }
 0x3bb   :  { %3679 = vmatmul.mubr.bf16.vlgmr.msra.gmra.mrb[32].mxu1 %v4993_v47 }
 0x3bc   :  { %3682 = vmatprep.mubr.bf16.mxu1 %v4998_v48 }
 0x3c3   :  { %3683 = vmatmul.mubr.bf16.gmra.mrb[36].mxu1 %v5005_v49 }
 0x3c4   :  { %3686 = vmatprep.mubr.bf16.mxu1 %v5010_v50 }
 0x3cb   :  { %3687 = vmatmul.mubr.bf16.gmra.mrb[40].mxu1 %v5017_v51 }
 0x3cc   :  { %3690 = vmatprep.mubr.bf16.mxu1 %v5022_v52 }
 0x3d3   :  { %3691 = vmatmul.mubr.bf16.gmra.mrb[44].mxu1 %v5029_v53 }
 0x3d4   :  { %3742 = vmatprep.mubr.bf16.mxu1 %v4987_v16 }
 0x48e   :  { %v3680_v31 = vpop.f32.mrb[32].mxu1 }
 0x48f   :  { %v846_v32 = vadd.f32 %v3680_v31, %v3184_v30  ;;  %v837_v33 = vpop.f32.mrb[33].mxu1 }
 0x490   :  { %v838_v36 = vadd.f32 %v3184_v30, %v837_v33  ;;  %v3681_v37 = vpop.f32.mrb[34].mxu1 }
 0x491   :  { %v849_v38 = vadd.f32 %v3681_v37, %v3184_v30  ;;  %v840_v39 = vpop.f32.mrb[35].mxu1  ;;  %v902_v41 = vmax.f32 %v846_v32, 0.0 }
 0x492   :  { %v841_v40 = vadd.f32 %v3184_v30, %v840_v39  ;;  %v900_v43 = vmax.f32 %v838_v36, 0.0 }
 0x493   :  { %v903_v42 = vmax.f32 %v849_v38, 0.0 }
 0x494   :  { %v901_v44 = vmax.f32 %v841_v40, 0.0 }
 0x495   :  { %v5071_v45 = vpack.c.bf16 %v903_v42, %v902_v41  ;;  %v4258_v42 = vld [vmem:[#allocation6] sm:$0xff]  }
 0x496   :  { %v5073_v46 = vpack.c.bf16 %v901_v44, %v900_v43  ;;  %v3684_v54 = vpop.f32.mrb[36].mxu1  ;;  %v4259_v43 = vld [vmem:[#allocation6 + $0x8] sm:$0xff]   ;;  %3758 = vmatprep.subr.bf16.mxu0 %v4258_v42  ;;  %v4260_v44 = vld [vmem:[#allocation6 + $0x10] sm:$0xff]  }
 0x497   :  { %v862_v58 = vadd.f32 %v3684_v54, %v3184_v30  ;;  %v853_v59 = vpop.f32.mrb[37].mxu1  ;;  %v4262_v54 = vld [vmem:[#allocation6 + $0x20] sm:$0xff]  }
 0x498   :  { %v854_v60 = vadd.f32 %v3184_v30, %v853_v59  ;;  %v3685_v56 = vpop.f32.mrb[38].mxu1  ;;  %3710 = vmatprep.mubr.bf16.mxu0 %v5073_v46 }
 0x499   :  { %v865_v61 = vadd.f32 %v3685_v56, %v3184_v30  ;;  %v856_v62 = vpop.f32.mrb[39].mxu1  ;;  %3711 = vmatmul.mubr.bf16.vlgmr.msra.gmra.mrb[16].mxu0 %v5071_v45  ;;  %v906_v0 = vmax.f32 %v862_v58, 0.0  ;;  %v4263_v58 = vld [vmem:[#allocation6 + $0x28] sm:$0xff]  }
 0x49a   :  { %v857_v63 = vadd.f32 %v3184_v30, %v856_v62  ;;  %v904_v2 = vmax.f32 %v854_v60, 0.0  ;;  %3759 = vmatpush3.bf16.msra.mxu0 %v4258_v42 }
 0x49b   :  { %v907_v1 = vmax.f32 %v865_v61, 0.0  ;;  %3760 = vmatprep.subr.bf16.mxu0 %v4259_v43 }
 0x49c   :  { %v905_v3 = vmax.f32 %v857_v63, 0.0 }
 0x49d   :  { %v5077_v4 = vpack.c.bf16 %v907_v1, %v906_v0 }
 0x49e   :  { %v5079_v6 = vpack.c.bf16 %v905_v3, %v904_v2  ;;  %v3688_v8 = vpop.f32.mrb[40].mxu1  ;;  %3761 = vmatpush3.bf16.msra.mxu0 %v4259_v43 }
 0x49f   :  { %v878_v9 = vadd.f32 %v3688_v8, %v3184_v30  ;;  %v869_v10 = vpop.f32.mrb[41].mxu1  ;;  %3762 = vmatprep.subr.bf16.mxu0 %v4260_v44 }
 0x4a0   :  { %v870_v11 = vadd.f32 %v3184_v30, %v869_v10  ;;  %v3689_v12 = vpop.f32.mrb[42].mxu1  ;;  %3714 = vmatprep.mubr.bf16.mxu0 %v5079_v6 }
 0x4a1   :  { %v881_v13 = vadd.f32 %v3689_v12, %v3184_v30  ;;  %v872_v14 = vpop.f32.mrb[43].mxu1  ;;  %3715 = vmatmul.mubr.bf16.gmra.mrb[20].mxu0 %v5077_v4  ;;  %v910_v17 = vmax.f32 %v878_v9, 0.0 }
 0x4a2   :  { %v873_v15 = vadd.f32 %v3184_v30, %v872_v14  ;;  %v908_v19 = vmax.f32 %v870_v11, 0.0  ;;  %3763 = vmatpush3.bf16.msra.mxu0 %v4260_v44 }
 0x4a3   :  { %v911_v18 = vmax.f32 %v881_v13, 0.0 }
 0x4a4   :  { %v909_v22 = vmax.f32 %v873_v15, 0.0 }
 0x4a5   :  { %v5083_v23 = vpack.c.bf16 %v911_v18, %v910_v17 }
 0x4a6   :  { %v5085_v24 = vpack.c.bf16 %v909_v22, %v908_v19  ;;  %v3692_v25 = vpop.f32.mrb[44].mxu1 }
 0x4a7   :  { %v894_v26 = vadd.f32 %v3692_v25, %v3184_v30  ;;  %v885_v27 = vpop.f32.mrb[45].mxu1 }
 0x4a8   :  { %v886_v28 = vadd.f32 %v3184_v30, %v885_v27  ;;  %v3693_v29 = vpop.f32.mrb[46].mxu1  ;;  %3718 = vmatprep.mubr.bf16.mxu0 %v5085_v24  ;;  %v4264_v27 = vld [vmem:[#allocation6 + $0x30] sm:$0xff]  }
 0x4a9   :  { %v897_v31 = vadd.f32 %v3693_v29, %v3184_v30  ;;  %v888_v32 = vpop.f32.mrb[47].mxu1  ;;  %3719 = vmatmul.mubr.bf16.gmra.mrb[24].mxu0 %v5083_v23  ;;  %v914_v36 = vmax.f32 %v894_v26, 0.0  ;;  %v3193_v29 = vld [vmem:[%s5360_s15] ss:$0 sm:$0xff] }
 0x4aa   :  { %v889_v33 = vadd.f32 %v3184_v30, %v888_v32  ;;  %v912_v38 = vmax.f32 %v886_v28, 0.0  ;;  %v4261_v30 = vld [vmem:[#allocation6 + $0x18] sm:$0xff]  }
 0x4ab   :  { %v915_v37 = vmax.f32 %v897_v31, 0.0  ;;  %3764 = vmatprep.subr.bf16.mxu0 %v4261_v30  ;;  %v4265_v28 = vld [vmem:[#allocation6 + $0x38] sm:$0xff]  }
 0x4ac   :  { %v913_v39 = vmax.f32 %v889_v33, 0.0  ;;  %3765 = vmatpush3.bf16.msra.mxu0 %v4261_v30 }
 0x4ad   :  { %v5089_v40 = vpack.c.bf16 %v915_v37, %v914_v36  ;;  %3766 = vmatprep.subr.bf16.mxu0 %v4262_v54 }
 0x4ae   :  { %v5091_v41 = vpack.c.bf16 %v913_v39, %v912_v38 }
 0x4b0   :  { %3722 = vmatprep.mubr.bf16.mxu0 %v5091_v41  ;;  %3767 = vmatpush3.bf16.msra.mxu0 %v4262_v54 }
 0x4b1   :  { %3723 = vmatmul.mubr.bf16.gmra.mrb[28].mxu0 %v5089_v40  ;;  %3768 = vmatprep.subr.bf16.mxu0 %v4263_v58 }
 0x4b4   :  { %3769 = vmatpush3.bf16.msra.mxu0 %v4263_v58 }
 0x4b5   :  { %3770 = vmatprep.subr.bf16.mxu0 %v4264_v27 }
 0x4b8   :  { %3771 = vmatpush3.bf16.msra.mxu0 %v4264_v27 }
 0x4b9   :  { %3772 = vmatprep.subr.bf16.mxu0 %v4265_v28 }
 0x4bc   :  { %3773 = vmatpush3.bf16.msra.mxu0 %v4265_v28 }
 0x56c   :  { %v3712_v59 = vpop.f32.mrb[16].mxu0 }
 0x56d   :  { %v1022_v60 = vpop.f32.mrb[17].mxu0 }
 0x56e   :  { %v3713_v56 = vpop.f32.mrb[18].mxu0 }
 0x56f   :  { %v1086_v61 = vpack.c.bf16 %v3713_v56, %v3712_v59  ;;  %v1025_v62 = vpop.f32.mrb[19].mxu0 }
 0x570   :  { %v1085_v63 = vpack.c.bf16 %v1025_v62, %v1022_v60 }
 0x572   :  { %3726 = vmatprep.subr.bf16.mxu1 %v1085_v63 }
 0x573   :  { %3727 = vmatpush3.bf16.msra.mxu1 %v1085_v63 }
 0x574   :  { %v3716_v0 = vpop.f32.mrb[20].mxu0  ;;  %3728 = vmatprep.subr.bf16.mxu1 %v1086_v61 }
 0x575   :  { %v1038_v1 = vpop.f32.mrb[21].mxu0 }
 0x576   :  { %v3717_v2 = vpop.f32.mrb[22].mxu0 }
 0x577   :  { %v1088_v3 = vpack.c.bf16 %v3717_v2, %v3716_v0  ;;  %v1041_v8 = vpop.f32.mrb[23].mxu0  ;;  %3729 = vmatpush3.bf16.msra.mxu1 %v1086_v61 }
 0x578   :  { %v1087_v9 = vpack.c.bf16 %v1041_v8, %v1038_v1 }
 0x57a   :  { %3730 = vmatprep.subr.bf16.mxu1 %v1087_v9 }
 0x57b   :  { %3731 = vmatpush3.bf16.msra.mxu1 %v1087_v9 }
 0x57c   :  { %v3720_v10 = vpop.f32.mrb[24].mxu0  ;;  %3732 = vmatprep.subr.bf16.mxu1 %v1088_v3 }
 0x57d   :  { %v1054_v11 = vpop.f32.mrb[25].mxu0 }
 0x57e   :  { %v3721_v12 = vpop.f32.mrb[26].mxu0 }
 0x57f   :  { %v1090_v13 = vpack.c.bf16 %v3721_v12, %v3720_v10  ;;  %v1057_v14 = vpop.f32.mrb[27].mxu0  ;;  %3733 = vmatpush3.bf16.msra.mxu1 %v1088_v3 }
 0x580   :  { %v1089_v15 = vpack.c.bf16 %v1057_v14, %v1054_v11 }
 0x582   :  { %3734 = vmatprep.subr.bf16.mxu1 %v1089_v15 }
 0x583   :  { %3735 = vmatpush3.bf16.msra.mxu1 %v1089_v15 }
 0x584   :  { %v3724_v17 = vpop.f32.mrb[28].mxu0  ;;  %3736 = vmatprep.subr.bf16.mxu1 %v1090_v13 }
 0x585   :  { %v1070_v18 = vpop.f32.mrb[29].mxu0 }
 0x586   :  { %v3725_v19 = vpop.f32.mrb[30].mxu0 }
 0x587   :  { %v1092_v22 = vpack.c.bf16 %v3725_v19, %v3724_v17  ;;  %v1073_v25 = vpop.f32.mrb[31].mxu0  ;;  %3737 = vmatpush3.bf16.msra.mxu1 %v1090_v13 }
 0x588   :  { %v1091_v26 = vpack.c.bf16 %v1073_v25, %v1070_v18 }
 0x58a   :  { %3738 = vmatprep.subr.bf16.mxu1 %v1091_v26 }
 0x58b   :  { %3739 = vmatpush3.bf16.msra.mxu1 %v1091_v26 }
 0x58c   :  { %3740 = vmatprep.subr.bf16.mxu1 %v1092_v22 }
 0x58f   :  { %3741 = vmatpush3.bf16.msra.mxu1 %v1092_v22 }
 0x592   :  { %3743 = vmatmul.mubr.bf16.vlgmr.msra.gmra.mrb[48].mxu1 %v4993_v47 }
 0x593   :  { %3746 = vmatprep.mubr.bf16.mxu1 %v4998_v48 }
 0x59a   :  { %3747 = vmatmul.mubr.bf16.gmra.mrb[52].mxu1 %v5005_v49 }
 0x59b   :  { %3750 = vmatprep.mubr.bf16.mxu1 %v5010_v50 }
 0x5a2   :  { %3751 = vmatmul.mubr.bf16.gmra.mrb[56].mxu1 %v5017_v51 }
 0x5a3   :  { %3754 = vmatprep.mubr.bf16.mxu1 %v5022_v52 }
 0x5aa   :  { %3755 = vmatmul.mubr.bf16.gmra.mrb[60].mxu1 %v5029_v53 }
 0x5ab   :  { %3806 = vmatprep.mubr.bf16.mxu1 %v4987_v16 }
 0x665   :  { %v3744_v31 = vpop.f32.mrb[48].mxu1 }
 0x666   :  { %v1143_v32 = vadd.f32 %v3744_v31, %v3193_v29  ;;  %v1134_v33 = vpop.f32.mrb[49].mxu1 }
 0x667   :  { %v1135_v36 = vadd.f32 %v3193_v29, %v1134_v33  ;;  %v3745_v37 = vpop.f32.mrb[50].mxu1 }
 0x668   :  { %v1146_v38 = vadd.f32 %v3745_v37, %v3193_v29  ;;  %v1137_v39 = vpop.f32.mrb[51].mxu1  ;;  %v1199_v43 = vmax.f32 %v1143_v32, 0.0 }
 0x669   :  { %v1138_v42 = vadd.f32 %v3193_v29, %v1137_v39  ;;  %v1197_v30 = vmax.f32 %v1135_v36, 0.0 }
 0x66a   :  { %v1200_v44 = vmax.f32 %v1146_v38, 0.0 }
 0x66b   :  { %v1198_v54 = vmax.f32 %v1138_v42, 0.0 }
 0x66c   :  { %v5106_v58 = vpack.c.bf16 %v1200_v44, %v1199_v43 }
 0x66d   :  { %v5108_v59 = vpack.c.bf16 %v1198_v54, %v1197_v30  ;;  %v3748_v60 = vpop.f32.mrb[52].mxu1 }
 0x66e   :  { %v1159_v56 = vadd.f32 %v3748_v60, %v3193_v29  ;;  %v1150_v61 = vpop.f32.mrb[53].mxu1 }
 0x66f   :  { %v1151_v62 = vadd.f32 %v3193_v29, %v1150_v61  ;;  %v3749_v63 = vpop.f32.mrb[54].mxu1  ;;  %3774 = vmatprep.mubr.bf16.mxu0 %v5108_v59 }
 0x670   :  { %v1162_v0 = vadd.f32 %v3749_v63, %v3193_v29  ;;  %v1153_v1 = vpop.f32.mrb[55].mxu1  ;;  %3775 = vmatmul.mubr.bf16.vlgmr.msra.gmra.mrb[32].mxu0 %v5106_v58  ;;  %v1203_v3 = vmax.f32 %v1159_v56, 0.0 }
 0x671   :  { %v1154_v2 = vadd.f32 %v3193_v29, %v1153_v1  ;;  %v1201_v9 = vmax.f32 %v1151_v62, 0.0  ;;  %v4267_v1 = vld [vmem:[#allocation9 + $0x8] sm:$0xff]  }
 0x672   :  { %v1204_v8 = vmax.f32 %v1162_v0, 0.0  ;;  %v4266_v0 = vld [vmem:[#allocation9] sm:$0xff]  }
 0x673   :  { %v1202_v10 = vmax.f32 %v1154_v2, 0.0  ;;  %3822 = vmatprep.subr.bf16.mxu0 %v4266_v0  ;;  %v4268_v2 = vld [vmem:[#allocation9 + $0x10] sm:$0xff]  }
 0x674   :  { %v5112_v11 = vpack.c.bf16 %v1204_v8, %v1203_v3  ;;  %3823 = vmatpush3.bf16.msra.mxu0 %v4266_v0  ;;  %v4270_v3 = vld [vmem:[#allocation9 + $0x20] sm:$0xff]   ;;  %v4271_v8 = vld [vmem:[#allocation9 + $0x28] sm:$0xff]  }
 0x675   :  { %v5114_v12 = vpack.c.bf16 %v1202_v10, %v1201_v9  ;;  %v3752_v13 = vpop.f32.mrb[56].mxu1  ;;  %3824 = vmatprep.subr.bf16.mxu0 %v4267_v1 }
 0x676   :  { %v1175_v14 = vadd.f32 %v3752_v13, %v3193_v29  ;;  %v1166_v15 = vpop.f32.mrb[57].mxu1 }
 0x677   :  { %v1167_v17 = vadd.f32 %v3193_v29, %v1166_v15  ;;  %v3753_v18 = vpop.f32.mrb[58].mxu1  ;;  %3778 = vmatprep.mubr.bf16.mxu0 %v5114_v12 }
 0x678   :  { %v1178_v19 = vadd.f32 %v3753_v18, %v3193_v29  ;;  %v1169_v22 = vpop.f32.mrb[59].mxu1  ;;  %3779 = vmatmul.mubr.bf16.gmra.mrb[36].mxu0 %v5112_v11  ;;  %v1207_v26 = vmax.f32 %v1175_v14, 0.0 }
 0x679   :  { %v1170_v25 = vadd.f32 %v3193_v29, %v1169_v22  ;;  %v1205_v28 = vmax.f32 %v1167_v17, 0.0  ;;  %3825 = vmatpush3.bf16.msra.mxu0 %v4267_v1 }
 0x67a   :  { %v1208_v27 = vmax.f32 %v1178_v19, 0.0  ;;  %3826 = vmatprep.subr.bf16.mxu0 %v4268_v2 }
 0x67b   :  { %v1206_v31 = vmax.f32 %v1170_v25, 0.0 }
 0x67c   :  { %v5118_v32 = vpack.c.bf16 %v1208_v27, %v1207_v26 }
 0x67d   :  { %v5120_v33 = vpack.c.bf16 %v1206_v31, %v1205_v28  ;;  %v3756_v36 = vpop.f32.mrb[60].mxu1  ;;  %3827 = vmatpush3.bf16.msra.mxu0 %v4268_v2 }
 0x67e   :  { %v1191_v37 = vadd.f32 %v3756_v36, %v3193_v29  ;;  %v1182_v38 = vpop.f32.mrb[61].mxu1 }
 0x67f   :  { %v1183_v39 = vadd.f32 %v3193_v29, %v1182_v38  ;;  %v3757_v42 = vpop.f32.mrb[62].mxu1  ;;  %3782 = vmatprep.mubr.bf16.mxu0 %v5120_v33 }
 0x680   :  { %v1194_v43 = vadd.f32 %v3757_v42, %v3193_v29  ;;  %v1185_v44 = vpop.f32.mrb[63].mxu1  ;;  %3783 = vmatmul.mubr.bf16.gmra.mrb[40].mxu0 %v5118_v32  ;;  %v1211_v54 = vmax.f32 %v1191_v37, 0.0 }
 0x681   :  { %v1186_v30 = vadd.f32 %v3193_v29, %v1185_v44  ;;  %v1209_v56 = vmax.f32 %v1183_v39, 0.0  ;;  %v4269_v29 = vld [vmem:[#allocation9 + $0x18] sm:$0xff]  }
 0x682   :  { %v1212_v60 = vmax.f32 %v1194_v43, 0.0  ;;  %3828 = vmatprep.subr.bf16.mxu0 %v4269_v29 }
 0x683   :  { %v1210_v61 = vmax.f32 %v1186_v30, 0.0  ;;  %3829 = vmatpush3.bf16.msra.mxu0 %v4269_v29 }
 0x684   :  { %v5124_v62 = vpack.c.bf16 %v1212_v60, %v1211_v54  ;;  %3830 = vmatprep.subr.bf16.mxu0 %v4270_v3 }
 0x685   :  { %v5126_v63 = vpack.c.bf16 %v1210_v61, %v1209_v56  ;;  %v4272_v56 = vld [vmem:[#allocation9 + $0x30] sm:$0xff]   ;;  %v4273_v61 = vld [vmem:[#allocation9 + $0x38] sm:$0xff]  }
 0x687   :  { %3786 = vmatprep.mubr.bf16.mxu0 %v5126_v63  ;;  %3831 = vmatpush3.bf16.msra.mxu0 %v4270_v3  ;;  %v4275_v3 = vld [vmem:[#allocation7 + $0x8] sm:$0xff]  }
 0x688   :  { %3787 = vmatmul.mubr.bf16.gmra.mrb[44].mxu0 %v5124_v62  ;;  %3832 = vmatprep.subr.bf16.mxu0 %v4271_v8 }
 0x68b   :  { %3833 = vmatpush3.bf16.msra.mxu0 %v4271_v8 }
 0x68c   :  { %3834 = vmatprep.subr.bf16.mxu0 %v4272_v56 }
 0x68f   :  { %3835 = vmatpush3.bf16.msra.mxu0 %v4272_v56 }
 0x690   :  { %3836 = vmatprep.subr.bf16.mxu0 %v4273_v61 }
 0x693   :  { %3837 = vmatpush3.bf16.msra.mxu0 %v4273_v61 }
 0x743   :  { %v3776_v9 = vpop.f32.mrb[32].mxu0 }
 0x744   :  { %v1319_v10 = vpop.f32.mrb[33].mxu0 }
 0x745   :  { %v3777_v13 = vpop.f32.mrb[34].mxu0 }
 0x746   :  { %v1383_v14 = vpack.c.bf16 %v3777_v13, %v3776_v9  ;;  %v1322_v15 = vpop.f32.mrb[35].mxu0 }
 0x747   :  { %v1382_v17 = vpack.c.bf16 %v1322_v15, %v1319_v10 }
 0x749   :  { %3790 = vmatprep.subr.bf16.mxu1 %v1382_v17 }
 0x74a   :  { %3791 = vmatpush3.bf16.msra.mxu1 %v1382_v17  ;;  %v4276_v17 = vld [vmem:[#allocation7 + $0x10] sm:$0xff]  }
 0x74b   :  { %v3780_v18 = vpop.f32.mrb[36].mxu0  ;;  %3792 = vmatprep.subr.bf16.mxu1 %v1383_v14 }
 0x74c   :  { %v1335_v19 = vpop.f32.mrb[37].mxu0 }
 0x74d   :  { %v3781_v22 = vpop.f32.mrb[38].mxu0 }
 0x74e   :  { %v1385_v25 = vpack.c.bf16 %v3781_v22, %v3780_v18  ;;  %v1338_v26 = vpop.f32.mrb[39].mxu0  ;;  %3793 = vmatpush3.bf16.msra.mxu1 %v1383_v14 }
 0x74f   :  { %v1384_v27 = vpack.c.bf16 %v1338_v26, %v1335_v19  ;;  %v4277_v26 = vld [vmem:[#allocation7 + $0x18] sm:$0xff]  }
 0x751   :  { %3794 = vmatprep.subr.bf16.mxu1 %v1384_v27 }
 0x752   :  { %3795 = vmatpush3.bf16.msra.mxu1 %v1384_v27 }
 0x753   :  { %v3784_v28 = vpop.f32.mrb[40].mxu0  ;;  %3796 = vmatprep.subr.bf16.mxu1 %v1385_v25 }
 0x754   :  { %v1351_v31 = vpop.f32.mrb[41].mxu0 }
 0x755   :  { %v3785_v36 = vpop.f32.mrb[42].mxu0 }
 0x756   :  { %v1387_v37 = vpack.c.bf16 %v3785_v36, %v3784_v28  ;;  %v1354_v38 = vpop.f32.mrb[43].mxu0  ;;  %3797 = vmatpush3.bf16.msra.mxu1 %v1385_v25 }
 0x757   :  { %v1386_v39 = vpack.c.bf16 %v1354_v38, %v1351_v31 }
 0x759   :  { %3798 = vmatprep.subr.bf16.mxu1 %v1386_v39 }
 0x75a   :  { %3799 = vmatpush3.bf16.msra.mxu1 %v1386_v39  ;;  %v4278_v39 = vld [vmem:[#allocation7 + $0x20] sm:$0xff]  }
 0x75b   :  { %v3788_v42 = vpop.f32.mrb[44].mxu0  ;;  %3800 = vmatprep.subr.bf16.mxu1 %v1387_v37 }
 0x75c   :  { %v1367_v43 = vpop.f32.mrb[45].mxu0 }
 0x75d   :  { %v3789_v44 = vpop.f32.mrb[46].mxu0 }
 0x75e   :  { %v1389_v30 = vpack.c.bf16 %v3789_v44, %v3788_v42  ;;  %v1370_v54 = vpop.f32.mrb[47].mxu0  ;;  %3801 = vmatpush3.bf16.msra.mxu1 %v1387_v37 }
 0x75f   :  { %v1388_v60 = vpack.c.bf16 %v1370_v54, %v1367_v43  ;;  %v4279_v54 = vld [vmem:[#allocation7 + $0x28] sm:$0xff]  }
 0x761   :  { %3802 = vmatprep.subr.bf16.mxu1 %v1388_v60 }
 0x762   :  { %3803 = vmatpush3.bf16.msra.mxu1 %v1388_v60 }
 0x763   :  { %3804 = vmatprep.subr.bf16.mxu1 %v1389_v30 }
 0x766   :  { %3805 = vmatpush3.bf16.msra.mxu1 %v1389_v30 }
 0x769   :  { %3807 = vmatmul.mubr.bf16.vlgmr.msra.gmra.mrb[64].mxu1 %v4993_v47  ;;  %v4274_v47 = vld [vmem:[#allocation7] sm:$0xff]  }
 0x76a   :  { %3810 = vmatprep.mubr.bf16.mxu1 %v4998_v48  ;;  %3854 = vmatprep.subr.bf16.mxu0 %v4274_v47 }
 0x771   :  { %3811 = vmatmul.mubr.bf16.gmra.mrb[68].mxu1 %v5005_v49  ;;  %v3202_v49 = vld [vmem:[%s5361_s16] ss:$0 sm:$0xff] }
 0x772   :  { %3814 = vmatprep.mubr.bf16.mxu1 %v5010_v50 }
 0x779   :  { %3815 = vmatmul.mubr.bf16.gmra.mrb[72].mxu1 %v5017_v51 }
 0x77a   :  { %3818 = vmatprep.mubr.bf16.mxu1 %v5022_v52 }
 0x781   :  { %3819 = vmatmul.mubr.bf16.gmra.mrb[76].mxu1 %v5029_v53 }
 0x782   :  { %3902 = vmatprep.mubr.bf16.mxu1 %v4987_v16 }
 0x83c   :  { %v3808_v48 = vpop.f32.mrb[64].mxu1 }
 0x83d   :  { %v1431_v50 = vpop.f32.mrb[65].mxu1  ;;  %v1440_v52 = vadd.f32 %v3808_v48, %v3202_v49 }
 0x83e   :  { %v3809_v51 = vpop.f32.mrb[66].mxu1  ;;  %v1432_v1 = vadd.f32 %v3202_v49, %v1431_v50 }
 0x83f   :  { %v1443_v0 = vadd.f32 %v3809_v51, %v3202_v49  ;;  %v1434_v53 = vpop.f32.mrb[67].mxu1  ;;  %v4280_v51 = vld [vmem:[#allocation7 + $0x30] sm:$0xff]  }
 0x840   :  { %v1435_v16 = vadd.f32 %v3202_v49, %v1434_v53 }
 0x841   :  { %v1495_v2 = vpack.c.bf16 %v1443_v0, %v1440_v52 }
 0x842   :  { %v1494_v29 = vpack.c.bf16 %v1435_v16, %v1432_v1  ;;  %v4281_v16 = vld [vmem:[#allocation7 + $0x38] sm:$0xff]  }
 0x844   :  { %v3812_v8 = vpop.f32.mrb[68].mxu1  ;;  %3838 = vmatprep.mubr.bf16.mxu0 %v1494_v29 }
 0x845   :  { %v1447_v9 = vpop.f32.mrb[69].mxu1  ;;  %3839 = vmatmul.mubr.bf16.vlgmr.msra.gmra.mrb[48].mxu0 %v1495_v2  ;;  %v1456_v13 = vadd.f32 %v3812_v8, %v3202_v49 }
 0x846   :  { %v3813_v10 = vpop.f32.mrb[70].mxu1  ;;  %3855 = vmatpush3.bf16.msra.mxu0 %v4274_v47  ;;  %v1448_v18 = vadd.f32 %v3202_v49, %v1447_v9 }
 0x847   :  { %v1459_v14 = vadd.f32 %v3813_v10, %v3202_v49  ;;  %v1450_v15 = vpop.f32.mrb[71].mxu1  ;;  %3856 = vmatprep.subr.bf16.mxu0 %v4275_v3 }
 0x848   :  { %v1451_v19 = vadd.f32 %v3202_v49, %v1450_v15 }
 0x849   :  { %v1497_v22 = vpack.c.bf16 %v1459_v14, %v1456_v13 }
 0x84a   :  { %v1496_v25 = vpack.c.bf16 %v1451_v19, %v1448_v18  ;;  %3857 = vmatpush3.bf16.msra.mxu0 %v4275_v3 }
 0x84b   :  { %3858 = vmatprep.subr.bf16.mxu0 %v4276_v17 }
 0x84c   :  { %v3816_v27 = vpop.f32.mrb[72].mxu1  ;;  %3842 = vmatprep.mubr.bf16.mxu0 %v1496_v25 }
 0x84d   :  { %v1463_v28 = vpop.f32.mrb[73].mxu1  ;;  %3843 = vmatmul.mubr.bf16.gmra.mrb[52].mxu0 %v1497_v22  ;;  %v1472_v36 = vadd.f32 %v3816_v27, %v3202_v49 }
 0x84e   :  { %v3817_v31 = vpop.f32.mrb[74].mxu1  ;;  %3859 = vmatpush3.bf16.msra.mxu0 %v4276_v17  ;;  %v1464_v42 = vadd.f32 %v3202_v49, %v1463_v28  ;;  %v4282_v28 = vld [vmem:[#allocation12] sm:$0xff]  }
 0x84f   :  { %v1475_v37 = vadd.f32 %v3817_v31, %v3202_v49  ;;  %v1466_v38 = vpop.f32.mrb[75].mxu1  ;;  %3860 = vmatprep.subr.bf16.mxu0 %v4277_v26  ;;  %v4283_v31 = vld [vmem:[#allocation12 + $0x8] sm:$0xff]  }
 0x850   :  { %v1467_v43 = vadd.f32 %v3202_v49, %v1466_v38  ;;  %v4284_v38 = vld [vmem:[#allocation12 + $0x10] sm:$0xff]  }
 0x851   :  { %v1499_v44 = vpack.c.bf16 %v1475_v37, %v1472_v36  ;;  %v5158_v36 = vld [vmem:[%s5382_s1 + $0x8] sm:$0xff]   ;;  %v5164_v37 = vld [vmem:[%s5382_s1 + $0x10] sm:$0xff]  }
 0x852   :  { %v1498_v30 = vpack.c.bf16 %v1467_v43, %v1464_v42  ;;  %3861 = vmatpush3.bf16.msra.mxu0 %v4277_v26  ;;  %v5170_v42 = vld [vmem:[%s5382_s1 + $0x18] sm:$0xff]   ;;  %v5176_v43 = vld [vmem:[%s5382_s1 + $0x20] sm:$0xff]  }
 0x853   :  { %3862 = vmatprep.subr.bf16.mxu0 %v4278_v39 }
 0x854   :  { %v3820_v60 = vpop.f32.mrb[76].mxu1  ;;  %3846 = vmatprep.mubr.bf16.mxu0 %v1498_v30  ;;  %v4287_v30 = vld [vmem:[#allocation12 + $0x28] sm:$0xff]  }
 0x855   :  { %v1479_v56 = vpop.f32.mrb[77].mxu1  ;;  %3847 = vmatmul.mubr.bf16.gmra.mrb[56].mxu0 %v1499_v44  ;;  %v1488_v47 = vadd.f32 %v3820_v60, %v3202_v49  ;;  %v4286_v44 = vld [vmem:[#allocation12 + $0x20] sm:$0xff]   ;;  %v5188_v60 = vld [vmem:[%s5382_s1 + $0x30] sm:$0xff]  }
 0x856   :  { %v3821_v61 = vpop.f32.mrb[78].mxu1  ;;  %3863 = vmatpush3.bf16.msra.mxu0 %v4278_v39  ;;  %v1480_v52 = vadd.f32 %v3202_v49, %v1479_v56  ;;  %v4285_v39 = vld [vmem:[#allocation12 + $0x18] sm:$0xff]  }
 0x857   :  { %v1491_v48 = vadd.f32 %v3821_v61, %v3202_v49  ;;  %v1482_v50 = vpop.f32.mrb[79].mxu1  ;;  %3864 = vmatprep.subr.bf16.mxu0 %v4279_v54  ;;  %v5194_v56 = vld [vmem:[%s5382_s1 + $0x38] sm:$0xff]   ;;  %v4288_v61 = vld [vmem:[#allocation12 + $0x30] sm:$0xff]  }
 0x858   :  { %v1483_v0 = vadd.f32 %v3202_v49, %v1482_v50  ;;  %v5200_v50 = vld [vmem:[%s5362_s17] ss:$0 sm:$0xff] }
 0x859   :  { %v1501_v53 = vpack.c.bf16 %v1491_v48, %v1488_v47  ;;  %v4289_v47 = vld [vmem:[#allocation12 + $0x38] sm:$0xff]   ;;  %v4290_v48 = vld [vmem:[#allocation10] sm:$0xff]  }
 0x85a   :  { %v1500_v1 = vpack.c.bf16 %v1483_v0, %v1480_v52  ;;  %3865 = vmatpush3.bf16.msra.mxu0 %v4279_v54  ;;  %v5182_v54 = vld [vmem:[%s5382_s1 + $0x28] sm:$0xff]  }
 0x85b   :  { %3866 = vmatprep.subr.bf16.mxu0 %v4280_v51 }
 0x85c   :  { %3850 = vmatprep.mubr.bf16.mxu0 %v1500_v1 }
 0x85d   :  { %3851 = vmatmul.mubr.bf16.gmra.mrb[60].mxu0 %v1501_v53 }
 0x85e   :  { %3867 = vmatpush3.bf16.msra.mxu0 %v4280_v51  ;;  %3870 = vmatprep.mubr.bf16.mxu0 %v5108_v59  ;;  %v5152_v59 = vld [vmem:[%s5382_s1] sm:$0xff]  }
 0x85f   :  { %3868 = vmatprep.subr.bf16.mxu0 %v4281_v16 }
 0x862   :  { %3869 = vmatpush3.bf16.msra.mxu0 %v4281_v16 }
 0x865   :  { %3871 = vmatmul.mubr.bf16.vlgmr.msra.gmra.mrb[48].mxu0 %v5106_v58 }
 0x866   :  { %3874 = vmatprep.mubr.bf16.mxu0 %v5114_v12 }
 0x86d   :  { %3875 = vmatmul.mubr.bf16.gmra.mrb[52].mxu0 %v5112_v11 }
 0x86e   :  { %3878 = vmatprep.mubr.bf16.mxu0 %v5120_v33 }
 0x875   :  { %3879 = vmatmul.mubr.bf16.gmra.mrb[56].mxu0 %v5118_v32 }
 0x876   :  { %3882 = vmatprep.mubr.bf16.mxu0 %v5126_v63 }
 0x87d   :  { %3883 = vmatmul.mubr.bf16.gmra.mrb[60].mxu0 %v5124_v62 }
 0x87e   :  { %3998 = vmatprep.mubr.bf16.mxu0 %v5152_v59 }
 0x938   :  { %v3872_v58 = vpop.f32.mrb[48].mxu0 }
 0x939   :  { %v1761_v49 = vpop.f32.mrb[49].mxu0 }
 0x93a   :  { %v3873_v12 = vpop.f32.mrb[50].mxu0 }
 0x93b   :  { %v1825_v2 = vpack.c.bf16 %v3873_v12, %v3872_v58  ;;  %v1764_v11 = vpop.f32.mrb[51].mxu0 }
 0x93c   :  { %v1824_v29 = vpack.c.bf16 %v1764_v11, %v1761_v49 }
 0x93e   :  { %3886 = vmatprep.subr.bf16.mxu1 %v1824_v29 }
 0x93f   :  { %3887 = vmatpush3.bf16.msra.mxu1 %v1824_v29 }
 0x940   :  { %v3876_v32 = vpop.f32.mrb[52].mxu0  ;;  %3888 = vmatprep.subr.bf16.mxu1 %v1825_v2 }
 0x941   :  { %v1777_v33 = vpop.f32.mrb[53].mxu0 }
 0x942   :  { %v3877_v63 = vpop.f32.mrb[54].mxu0 }
 0x943   :  { %v1827_v62 = vpack.c.bf16 %v3877_v63, %v3876_v32  ;;  %v1780_v3 = vpop.f32.mrb[55].mxu0  ;;  %3889 = vmatpush3.bf16.msra.mxu1 %v1825_v2 }
 0x944   :  { %v1826_v8 = vpack.c.bf16 %v1780_v3, %v1777_v33 }
 0x946   :  { %3890 = vmatprep.subr.bf16.mxu1 %v1826_v8 }
 0x947   :  { %3891 = vmatpush3.bf16.msra.mxu1 %v1826_v8  ;;  %v4291_v8 = vld [vmem:[#allocation10 + $0x8] sm:$0xff]  }
 0x948   :  { %v3880_v9 = vpop.f32.mrb[56].mxu0  ;;  %3892 = vmatprep.subr.bf16.mxu1 %v1827_v62 }
 0x949   :  { %v1793_v10 = vpop.f32.mrb[57].mxu0 }
 0x94a   :  { %v3881_v13 = vpop.f32.mrb[58].mxu0 }
 0x94b   :  { %v1829_v14 = vpack.c.bf16 %v3881_v13, %v3880_v9  ;;  %v1796_v15 = vpop.f32.mrb[59].mxu0  ;;  %3893 = vmatpush3.bf16.msra.mxu1 %v1827_v62 }
 0x94c   :  { %v1828_v17 = vpack.c.bf16 %v1796_v15, %v1793_v10 }
 0x94e   :  { %3894 = vmatprep.subr.bf16.mxu1 %v1828_v17 }
 0x94f   :  { %3895 = vmatpush3.bf16.msra.mxu1 %v1828_v17 }
 0x950   :  { %v3884_v18 = vpop.f32.mrb[60].mxu0  ;;  %3896 = vmatprep.subr.bf16.mxu1 %v1829_v14 }
 0x951   :  { %v1809_v19 = vpop.f32.mrb[61].mxu0 }
 0x952   :  { %v3885_v22 = vpop.f32.mrb[62].mxu0 }
 0x953   :  { %v1831_v25 = vpack.c.bf16 %v3885_v22, %v3884_v18  ;;  %v1812_v26 = vpop.f32.mrb[63].mxu0  ;;  %3897 = vmatpush3.bf16.msra.mxu1 %v1829_v14 }
 0x954   :  { %v1830_v27 = vpack.c.bf16 %v1812_v26, %v1809_v19  ;;  %v4292_v19 = vld [vmem:[#allocation10 + $0x10] sm:$0xff]  }
 0x956   :  { %3898 = vmatprep.subr.bf16.mxu1 %v1830_v27 }
 0x957   :  { %3899 = vmatpush3.bf16.msra.mxu1 %v1830_v27 }
 0x958   :  { %3900 = vmatprep.subr.bf16.mxu1 %v1831_v25 }
 0x95b   :  { %3901 = vmatpush3.bf16.msra.mxu1 %v1831_v25 }
 0x95c   :  { %3918 = vmatprep.subr.bf16.mxu1 %v4282_v28 }
 0x95e   :  { %3903 = vmatmul.mubr.bf16.vlgmr.msra.gmra.mrb[80].mxu1 %v5158_v36 }
 0x95f   :  { %3906 = vmatprep.mubr.bf16.mxu1 %v5164_v37  ;;  %3919 = vmatpush3.bf16.msra.mxu1 %v4282_v28 }
 0x960   :  { %3920 = vmatprep.subr.bf16.mxu1 %v4283_v31 }
 0x963   :  { %3921 = vmatpush3.bf16.msra.mxu1 %v4283_v31 }
 0x964   :  { %3922 = vmatprep.subr.bf16.mxu1 %v4284_v38 }
 0x966   :  { %3907 = vmatmul.mubr.bf16.gmra.mrb[84].mxu1 %v5170_v42 }
 0x967   :  { %3910 = vmatprep.mubr.bf16.mxu1 %v5176_v43  ;;  %3923 = vmatpush3.bf16.msra.mxu1 %v4284_v38 }
 0x968   :  { %3924 = vmatprep.subr.bf16.mxu1 %v4285_v39 }
 0x96b   :  { %3925 = vmatpush3.bf16.msra.mxu1 %v4285_v39  ;;  %v4293_v39 = vld [vmem:[#allocation10 + $0x18] sm:$0xff]  }
 0x96c   :  { %3926 = vmatprep.subr.bf16.mxu1 %v4286_v44 }
 0x96e   :  { %3911 = vmatmul.mubr.bf16.gmra.mrb[88].mxu1 %v5182_v54 }
 0x96f   :  { %3914 = vmatprep.mubr.bf16.mxu1 %v5188_v60  ;;  %3927 = vmatpush3.bf16.msra.mxu1 %v4286_v44 }
 0x970   :  { %3928 = vmatprep.subr.bf16.mxu1 %v4287_v30 }
 0x973   :  { %3929 = vmatpush3.bf16.msra.mxu1 %v4287_v30 }
 0x974   :  { %3930 = vmatprep.subr.bf16.mxu1 %v4288_v61 }
 0x976   :  { %3915 = vmatmul.mubr.bf16.gmra.mrb[92].mxu1 %v5194_v56 }
 0x977   :  { %3931 = vmatpush3.bf16.msra.mxu1 %v4288_v61 }
 0x978   :  { %3932 = vmatprep.subr.bf16.mxu1 %v4289_v47 }
 0x97b   :  { %3933 = vmatpush3.bf16.msra.mxu1 %v4289_v47 }
 0x97c   :  { %3950 = vmatprep.subr.bf16.mxu1 %v4290_v48 }
 0xa31   :  { %v3904_v51 = vpop.f32.mrb[80].mxu1 }
 0xa32   :  { %v1882_v52 = vadd.f32 %v3904_v51, %v5200_v50  ;;  %v1873_v0 = vpop.f32.mrb[81].mxu1 }
 0xa33   :  { %v1874_v53 = vadd.f32 %v5200_v50, %v1873_v0  ;;  %v3905_v1 = vpop.f32.mrb[82].mxu1  ;;  %v4294_v0 = vld [vmem:[#allocation10 + $0x20] sm:$0xff]  }
 0xa34   :  { %v1885_v16 = vadd.f32 %v3905_v1, %v5200_v50  ;;  %v1876_v58 = vpop.f32.mrb[83].mxu1  ;;  %v1938_v12 = vmax.f32 %v1882_v52, 0.0 }
 0xa35   :  { %v1877_v49 = vadd.f32 %v5200_v50, %v1876_v58  ;;  %v1936_v11 = vmax.f32 %v1874_v53, 0.0 }
 0xa36   :  { %v1939_v2 = vmax.f32 %v1885_v16, 0.0 }
 0xa37   :  { %v1937_v29 = vmax.f32 %v1877_v49, 0.0 }
 0xa38   :  { %v1953_v32 = vpack.c.bf16 %v1939_v2, %v1938_v12 }
 0xa39   :  { %v1952_v33 = vpack.c.bf16 %v1937_v29, %v1936_v11  ;;  %v3908_v63 = vpop.f32.mrb[84].mxu1  ;;  %v4295_v11 = vld [vmem:[#allocation10 + $0x28] sm:$0xff]  }
 0xa3a   :  { %v1898_v62 = vadd.f32 %v3908_v63, %v5200_v50  ;;  %v1889_v3 = vpop.f32.mrb[85].mxu1 }
 0xa3b   :  { %v1890_v9 = vadd.f32 %v5200_v50, %v1889_v3  ;;  %v3909_v10 = vpop.f32.mrb[86].mxu1  ;;  %3934 = vmatprep.mubr.bf16.mxu1 %v1952_v33 }
 0xa3c   :  { %v1901_v13 = vadd.f32 %v3909_v10, %v5200_v50  ;;  %v1892_v14 = vpop.f32.mrb[87].mxu1  ;;  %3935 = vmatmul.mubr.bf16.vlgmr.msra.gmra.mrb[96].mxu1 %v1953_v32  ;;  %v1942_v17 = vmax.f32 %v1898_v62, 0.0 }
 0xa3d   :  { %v1893_v15 = vadd.f32 %v5200_v50, %v1892_v14  ;;  %3951 = vmatpush3.bf16.msra.mxu1 %v4290_v48  ;;  %v1940_v22 = vmax.f32 %v1890_v9, 0.0  ;;  %v4296_v9 = vld [vmem:[#allocation10 + $0x30] sm:$0xff]  }
 0xa3e   :  { %v1943_v18 = vmax.f32 %v1901_v13, 0.0  ;;  %3952 = vmatprep.subr.bf16.mxu1 %v4291_v8 }
 0xa3f   :  { %v1941_v25 = vmax.f32 %v1893_v15, 0.0 }
 0xa40   :  { %v1955_v26 = vpack.c.bf16 %v1943_v18, %v1942_v17  ;;  %v4297_v17 = vld [vmem:[#allocation10 + $0x38] sm:$0xff]  }
 0xa41   :  { %v1954_v27 = vpack.c.bf16 %v1941_v25, %v1940_v22  ;;  %v3912_v28 = vpop.f32.mrb[88].mxu1  ;;  %3953 = vmatpush3.bf16.msra.mxu1 %v4291_v8 }
 0xa42   :  { %v1914_v31 = vadd.f32 %v3912_v28, %v5200_v50  ;;  %v1905_v38 = vpop.f32.mrb[89].mxu1  ;;  %3954 = vmatprep.subr.bf16.mxu1 %v4292_v19 }
 0xa43   :  { %v1906_v44 = vadd.f32 %v5200_v50, %v1905_v38  ;;  %v3913_v30 = vpop.f32.mrb[90].mxu1  ;;  %3938 = vmatprep.mubr.bf16.mxu1 %v1954_v27 }
 0xa44   :  { %v1917_v61 = vadd.f32 %v3913_v30, %v5200_v50  ;;  %v1908_v47 = vpop.f32.mrb[91].mxu1  ;;  %3939 = vmatmul.mubr.bf16.gmra.mrb[100].mxu1 %v1955_v26  ;;  %v1946_v51 = vmax.f32 %v1914_v31, 0.0 }
 0xa45   :  { %v1909_v48 = vadd.f32 %v5200_v50, %v1908_v47  ;;  %3955 = vmatpush3.bf16.msra.mxu1 %v4292_v19  ;;  %v1944_v53 = vmax.f32 %v1906_v44, 0.0 }
 0xa46   :  { %v1947_v52 = vmax.f32 %v1917_v61, 0.0  ;;  %3956 = vmatprep.subr.bf16.mxu1 %v4293_v39 }
 0xa47   :  { %v1945_v1 = vmax.f32 %v1909_v48, 0.0  ;;  %v4298_v48 = vld [vmem:[#allocation15] sm:$0xff]  }
 0xa48   :  { %v1957_v16 = vpack.c.bf16 %v1947_v52, %v1946_v51  ;;  %v4299_v51 = vld [vmem:[#allocation15 + $0x8] sm:$0xff]   ;;  %v4300_v52 = vld [vmem:[#allocation15 + $0x10] sm:$0xff]  }
 0xa49   :  { %v1956_v58 = vpack.c.bf16 %v1945_v1, %v1944_v53  ;;  %v3916_v49 = vpop.f32.mrb[92].mxu1  ;;  %3957 = vmatpush3.bf16.msra.mxu1 %v4293_v39  ;;  %v4302_v53 = vld [vmem:[#allocation15 + $0x20] sm:$0xff]   ;;  %v4303_v1 = vld [vmem:[#allocation15 + $0x28] sm:$0xff]  }
 0xa4a   :  { %v1930_v12 = vadd.f32 %v3916_v49, %v5200_v50  ;;  %v1921_v2 = vpop.f32.mrb[93].mxu1  ;;  %3958 = vmatprep.subr.bf16.mxu1 %v4294_v0  ;;  %v4394_v49 = vld [vmem:[%s5381_s9] sm:$0xff]  }
 0xa4b   :  { %v1922_v29 = vadd.f32 %v5200_v50, %v1921_v2  ;;  %v3917_v32 = vpop.f32.mrb[94].mxu1  ;;  %3942 = vmatprep.mubr.bf16.mxu1 %v1956_v58  ;;  %v4305_v58 = vld [vmem:[#allocation15 + $0x38] sm:$0xff]   ;;  %v4307_v2 = vld [vmem:[#allocation13 + $0x8] sm:$0xff]  }
 0xa4c   :  { %v1933_v33 = vadd.f32 %v3917_v32, %v5200_v50  ;;  %v1924_v63 = vpop.f32.mrb[95].mxu1  ;;  %3943 = vmatmul.mubr.bf16.gmra.mrb[104].mxu1 %v1957_v16  ;;  %v1950_v3 = vmax.f32 %v1930_v12, 0.0  ;;  %v4304_v16 = vld [vmem:[#allocation15 + $0x30] sm:$0xff]   ;;  %v4306_v12 = vld [vmem:[#allocation13] sm:$0xff]  }
 0xa4d   :  { %v1925_v62 = vadd.f32 %v5200_v50, %v1924_v63  ;;  %3959 = vmatpush3.bf16.msra.mxu1 %v4294_v0  ;;  %v1948_v10 = vmax.f32 %v1922_v29, 0.0  ;;  %v4301_v0 = vld [vmem:[#allocation15 + $0x18] sm:$0xff]   ;;  %v4396_v29 = vld [vmem:[%s5381_s9 + $0x10] sm:$0xff]  }
 0xa4e   :  { %v1951_v8 = vmax.f32 %v1933_v33, 0.0  ;;  %3960 = vmatprep.subr.bf16.mxu1 %v4295_v11  ;;  %v4308_v32 = vld [vmem:[#allocation13 + $0x10] sm:$0xff]   ;;  %v4309_v33 = vld [vmem:[#allocation13 + $0x18] sm:$0xff]  }
 0xa4f   :  { %v1949_v13 = vmax.f32 %v1925_v62, 0.0  ;;  %v4397_v63 = vld [vmem:[%s5381_s9 + $0x18] sm:$0xff]   ;;  %v4398_v62 = vld [vmem:[%s5381_s9 + $0x20] sm:$0xff]  }
 0xa50   :  { %v1959_v14 = vpack.c.bf16 %v1951_v8, %v1950_v3  ;;  %v4310_v3 = vld [vmem:[#allocation13 + $0x20] sm:$0xff]   ;;  %v4311_v8 = vld [vmem:[#allocation13 + $0x28] sm:$0xff]  }
 0xa51   :  { %v1958_v15 = vpack.c.bf16 %v1949_v13, %v1948_v10  ;;  %3961 = vmatpush3.bf16.msra.mxu1 %v4295_v11  ;;  %v4395_v11 = vld [vmem:[%s5381_s9 + $0x8] sm:$0xff]   ;;  %v4400_v10 = vld [vmem:[%s5381_s9 + $0x30] sm:$0xff]  }
 0xa52   :  { %3962 = vmatprep.subr.bf16.mxu1 %v4296_v9  ;;  %v4312_v13 = vld [vmem:[#allocation13 + $0x30] sm:$0xff]  }
 0xa53   :  { %3946 = vmatprep.mubr.bf16.mxu1 %v1958_v15  ;;  %v4401_v15 = vld [vmem:[%s5381_s9 + $0x38] sm:$0xff]  }
 0xa54   :  { %3947 = vmatmul.mubr.bf16.gmra.mrb[108].mxu1 %v1959_v14  ;;  %v4313_v14 = vld [vmem:[#allocation13 + $0x38] sm:$0xff]  }
 0xa55   :  { %3963 = vmatpush3.bf16.msra.mxu1 %v4296_v9  ;;  %3966 = vmatprep.mubr.bf16.mxu1 %v5073_v46  ;;  %v4399_v9 = vld [vmem:[%s5381_s9 + $0x28] sm:$0xff]  }
 0xa56   :  { %3964 = vmatprep.subr.bf16.mxu1 %v4297_v17 }
 0xa59   :  { %3965 = vmatpush3.bf16.msra.mxu1 %v4297_v17  ;;  %v4314_v17 = vld [vmem:[#allocation16] sm:$0xff]  }
 0xa5c   :  { %3967 = vmatmul.mubr.bf16.vlgmr.msra.gmra.mrb[96].mxu1 %v5071_v45 }
 0xa5d   :  { %3970 = vmatprep.mubr.bf16.mxu1 %v5079_v6 }
 0xa64   :  { %3971 = vmatmul.mubr.bf16.gmra.mrb[100].mxu1 %v5077_v4 }
 0xa65   :  { %3974 = vmatprep.mubr.bf16.mxu1 %v5085_v24 }
 0xa6c   :  { %3975 = vmatmul.mubr.bf16.gmra.mrb[104].mxu1 %v5083_v23 }
 0xa6d   :  { %3978 = vmatprep.mubr.bf16.mxu1 %v5091_v41 }
 0xa74   :  { %3979 = vmatmul.mubr.bf16.gmra.mrb[108].mxu1 %v5089_v40 }
 0xa75   :  { %4126 = vmatprep.mubr.bf16.mxu1 %v5152_v59 }
 0xb2f   :  { %v3968_v50 = vpop.f32.mrb[96].mxu1 }
 0xb30   :  { %v2219_v46 = vpop.f32.mrb[97].mxu1 }
 0xb31   :  { %v3969_v18 = vpop.f32.mrb[98].mxu1 }
 0xb32   :  { %v2283_v19 = vpack.c.bf16 %v3969_v18, %v3968_v50  ;;  %v2222_v22 = vpop.f32.mrb[99].mxu1  ;;  %v4315_v50 = vld [vmem:[#allocation16 + $0x8] sm:$0xff]   ;;  %v4317_v18 = vld [vmem:[#allocation16 + $0x18] sm:$0xff]  }
 0xb33   :  { %v2282_v45 = vpack.c.bf16 %v2222_v22, %v2219_v46  ;;  %v4316_v46 = vld [vmem:[#allocation16 + $0x10] sm:$0xff]  }
 0xb35   :  { %3982 = vmatprep.subr.bf16.mxu0 %v2282_v45 }
 0xb36   :  { %3983 = vmatpush3.bf16.msra.mxu0 %v2282_v45 }
 0xb37   :  { %v3972_v6 = vpop.f32.mrb[100].mxu1  ;;  %3984 = vmatprep.subr.bf16.mxu0 %v2283_v19 }
 0xb38   :  { %v2235_v4 = vpop.f32.mrb[101].mxu1 }
 0xb39   :  { %v3973_v24 = vpop.f32.mrb[102].mxu1 }
 0xb3a   :  { %v2285_v25 = vpack.c.bf16 %v3973_v24, %v3972_v6  ;;  %v2238_v23 = vpop.f32.mrb[103].mxu1  ;;  %3985 = vmatpush3.bf16.msra.mxu0 %v2283_v19  ;;  %v4319_v19 = vld [vmem:[#allocation16 + $0x28] sm:$0xff]  }
 0xb3b   :  { %v2284_v41 = vpack.c.bf16 %v2238_v23, %v2235_v4 }
 0xb3d   :  { %3986 = vmatprep.subr.bf16.mxu0 %v2284_v41 }
 0xb3e   :  { %3987 = vmatpush3.bf16.msra.mxu0 %v2284_v41 }
 0xb3f   :  { %v3976_v40 = vpop.f32.mrb[104].mxu1  ;;  %3988 = vmatprep.subr.bf16.mxu0 %v2285_v25 }
 0xb40   :  { %v2251_v59 = vpop.f32.mrb[105].mxu1 }
 0xb41   :  { %v3977_v26 = vpop.f32.mrb[106].mxu1 }
 0xb42   :  { %v2287_v27 = vpack.c.bf16 %v3977_v26, %v3976_v40  ;;  %v2254_v28 = vpop.f32.mrb[107].mxu1  ;;  %3989 = vmatpush3.bf16.msra.mxu0 %v2285_v25 }
 0xb43   :  { %v2286_v31 = vpack.c.bf16 %v2254_v28, %v2251_v59 }
 0xb45   :  { %3990 = vmatprep.subr.bf16.mxu0 %v2286_v31 }
 0xb46   :  { %3991 = vmatpush3.bf16.msra.mxu0 %v2286_v31 }
 0xb47   :  { %v3980_v38 = vpop.f32.mrb[108].mxu1  ;;  %3992 = vmatprep.subr.bf16.mxu0 %v2287_v27 }
 0xb48   :  { %v2267_v39 = vpop.f32.mrb[109].mxu1 }
 0xb49   :  { %v3981_v44 = vpop.f32.mrb[110].mxu1 }
 0xb4a   :  { %v2289_v30 = vpack.c.bf16 %v3981_v44, %v3980_v38  ;;  %v2270_v61 = vpop.f32.mrb[111].mxu1  ;;  %3993 = vmatpush3.bf16.msra.mxu0 %v2287_v27 }
 0xb4b   :  { %v2288_v47 = vpack.c.bf16 %v2270_v61, %v2267_v39 }
 0xb4d   :  { %3994 = vmatprep.subr.bf16.mxu0 %v2288_v47 }
 0xb4e   :  { %3995 = vmatpush3.bf16.msra.mxu0 %v2288_v47 }
 0xb4f   :  { %3996 = vmatprep.subr.bf16.mxu0 %v2289_v30 }
 0xb52   :  { %3997 = vmatpush3.bf16.msra.mxu0 %v2289_v30 }
 0xb53   :  { %4014 = vmatprep.subr.bf16.mxu0 %v4298_v48 }
 0xb55   :  { %3999 = vmatmul.mubr.bf16.vlgmr.msra.gmra.mrb[64].mxu0 %v5158_v36 }
 0xb56   :  { %4015 = vmatpush3.bf16.msra.mxu0 %v4298_v48  ;;  %4002 = vmatprep.mubr.bf16.mxu0 %v5164_v37 }
 0xb57   :  { %4016 = vmatprep.subr.bf16.mxu0 %v4299_v51 }
 0xb5a   :  { %4017 = vmatpush3.bf16.msra.mxu0 %v4299_v51 }
 0xb5b   :  { %4018 = vmatprep.subr.bf16.mxu0 %v4300_v52 }
 0xb5d   :  { %4003 = vmatmul.mubr.bf16.gmra.mrb[68].mxu0 %v5170_v42 }
 0xb5e   :  { %4019 = vmatpush3.bf16.msra.mxu0 %v4300_v52  ;;  %4006 = vmatprep.mubr.bf16.mxu0 %v5176_v43 }
 0xb5f   :  { %4020 = vmatprep.subr.bf16.mxu0 %v4301_v0 }
 0xb62   :  { %4021 = vmatpush3.bf16.msra.mxu0 %v4301_v0 }
 0xb63   :  { %4022 = vmatprep.subr.bf16.mxu0 %v4302_v53 }
 0xb65   :  { %4007 = vmatmul.mubr.bf16.gmra.mrb[72].mxu0 %v5182_v54 }
 0xb66   :  { %4023 = vmatpush3.bf16.msra.mxu0 %v4302_v53  ;;  %4010 = vmatprep.mubr.bf16.mxu0 %v5188_v60 }
 0xb67   :  { %4024 = vmatprep.subr.bf16.mxu0 %v4303_v1 }
 0xb6a   :  { %4025 = vmatpush3.bf16.msra.mxu0 %v4303_v1 }
 0xb6b   :  { %4026 = vmatprep.subr.bf16.mxu0 %v4304_v16 }
 0xb6d   :  { %4011 = vmatmul.mubr.bf16.gmra.mrb[76].mxu0 %v5194_v56 }
 0xb6e   :  { %4027 = vmatpush3.bf16.msra.mxu0 %v4304_v16  ;;  %4030 = vmatprep.mubr.bf16.mxu0 %v4394_v49 }
 0xb6f   :  { %4028 = vmatprep.subr.bf16.mxu0 %v4305_v58 }
 0xb72   :  { %4029 = vmatpush3.bf16.msra.mxu0 %v4305_v58 }
 0xb73   :  { %4046 = vmatprep.subr.bf16.mxu0 %v4306_v12 }
 0xb75   :  { %4031 = vmatmul.mubr.bf16.vlgmr.msra.gmra.mrb[80].mxu0 %v4395_v11 }
 0xb76   :  { %4047 = vmatpush3.bf16.msra.mxu0 %v4306_v12  ;;  %4034 = vmatprep.mubr.bf16.mxu0 %v4396_v29 }
 0xb77   :  { %4048 = vmatprep.subr.bf16.mxu0 %v4307_v2 }
 0xb7a   :  { %4049 = vmatpush3.bf16.msra.mxu0 %v4307_v2 }
 0xb7b   :  { %4050 = vmatprep.subr.bf16.mxu0 %v4308_v32 }
 0xb7d   :  { %4035 = vmatmul.mubr.bf16.gmra.mrb[84].mxu0 %v4397_v63 }
 0xb7e   :  { %4051 = vmatpush3.bf16.msra.mxu0 %v4308_v32  ;;  %4038 = vmatprep.mubr.bf16.mxu0 %v4398_v62 }
 0xb7f   :  { %4052 = vmatprep.subr.bf16.mxu0 %v4309_v33 }
 0xb82   :  { %4053 = vmatpush3.bf16.msra.mxu0 %v4309_v33 }
 0xb83   :  { %4054 = vmatprep.subr.bf16.mxu0 %v4310_v3 }
 0xb85   :  { %4039 = vmatmul.mubr.bf16.gmra.mrb[88].mxu0 %v4399_v9 }
 0xb86   :  { %4055 = vmatpush3.bf16.msra.mxu0 %v4310_v3  ;;  %4042 = vmatprep.mubr.bf16.mxu0 %v4400_v10 }
 0xb87   :  { %4056 = vmatprep.subr.bf16.mxu0 %v4311_v8 }
 0xb8a   :  { %4057 = vmatpush3.bf16.msra.mxu0 %v4311_v8 }
 0xb8b   :  { %4058 = vmatprep.subr.bf16.mxu0 %v4312_v13 }
 0xb8d   :  { %4043 = vmatmul.mubr.bf16.gmra.mrb[92].mxu0 %v4401_v15 }
 0xb8e   :  { %4059 = vmatpush3.bf16.msra.mxu0 %v4312_v13  ;;  %4062 = vmatprep.mubr.bf16.mxu0 %v5038_v7  ;;  %v4318_v7 = vld [vmem:[#allocation16 + $0x20] sm:$0xff]  }
 0xb8f   :  { %4060 = vmatprep.subr.bf16.mxu0 %v4313_v14 }
 0xb92   :  { %4061 = vmatpush3.bf16.msra.mxu0 %v4313_v14 }
 0xb93   :  { %4078 = vmatprep.subr.bf16.mxu0 %v4314_v17 }
 0xb95   :  { %4063 = vmatmul.mubr.bf16.vlgmr.msra.gmra.mrb[80].mxu0 %v5036_v5  ;;  %v4320_v5 = vld [vmem:[#allocation16 + $0x30] sm:$0xff]  }
 0xb96   :  { %4066 = vmatprep.mubr.bf16.mxu0 %v5044_v21  ;;  %4079 = vmatpush3.bf16.msra.mxu0 %v4314_v17  ;;  %v3236_v21 = vld [vmem:[%s5363_s18] ss:$0 sm:$0xff] }
 0xb97   :  { %4080 = vmatprep.subr.bf16.mxu0 %v4315_v50 }
 0xb9a   :  { %4081 = vmatpush3.bf16.msra.mxu0 %v4315_v50 }
 0xb9b   :  { %4082 = vmatprep.subr.bf16.mxu0 %v4316_v46 }
 0xb9d   :  { %4067 = vmatmul.mubr.bf16.gmra.mrb[84].mxu0 %v5042_v20  ;;  %v4321_v20 = vld [vmem:[#allocation16 + $0x38] sm:$0xff]  }
 0xb9e   :  { %4070 = vmatprep.mubr.bf16.mxu0 %v5050_v35  ;;  %4083 = vmatpush3.bf16.msra.mxu0 %v4316_v46 }
 0xb9f   :  { %4084 = vmatprep.subr.bf16.mxu0 %v4317_v18 }
 0xba2   :  { %4085 = vmatpush3.bf16.msra.mxu0 %v4317_v18 }
 0xba3   :  { %4086 = vmatprep.subr.bf16.mxu0 %v4318_v7 }
 0xba5   :  { %4071 = vmatmul.mubr.bf16.gmra.mrb[88].mxu0 %v5048_v34 }
 0xba6   :  { %4074 = vmatprep.mubr.bf16.mxu0 %v5056_v57  ;;  %4087 = vmatpush3.bf16.msra.mxu0 %v4318_v7 }
 0xba7   :  { %4088 = vmatprep.subr.bf16.mxu0 %v4319_v19 }
 0xbaa   :  { %4089 = vmatpush3.bf16.msra.mxu0 %v4319_v19 }
 0xbab   :  { %4090 = vmatprep.subr.bf16.mxu0 %v4320_v5 }
 0xbad   :  { %4075 = vmatmul.mubr.bf16.gmra.mrb[92].mxu0 %v5054_v55 }
 0xbae   :  { %4091 = vmatpush3.bf16.msra.mxu0 %v4320_v5 }
 0xbaf   :  { %4092 = vmatprep.subr.bf16.mxu0 %v4321_v20 }
 0xbb2   :  { %4093 = vmatpush3.bf16.msra.mxu0 %v4321_v20 }
 0xc28   :  { %v4000_v35 = vpop.f32.mrb[64].mxu0 }
 0xc29   :  { %v2340_v22 = vadd.f32 %v4000_v35, %v3236_v21  ;;  %v2331_v34 = vpop.f32.mrb[65].mxu0 }
 0xc2a   :  { %v2332_v45 = vadd.f32 %v3236_v21, %v2331_v34  ;;  %v4001_v57 = vpop.f32.mrb[66].mxu0 }
 0xc2b   :  { %v2343_v6 = vadd.f32 %v4001_v57, %v3236_v21  ;;  %v2334_v4 = vpop.f32.mrb[67].mxu0  ;;  %v2396_v25 = vmax.f32 %v2340_v22, 0.0 }
 0xc2c   :  { %v2335_v24 = vadd.f32 %v3236_v21, %v2334_v4  ;;  %v2394_v41 = vmax.f32 %v2332_v45, 0.0 }
 0xc2d   :  { %v2397_v23 = vmax.f32 %v2343_v6, 0.0 }
 0xc2e   :  { %v2395_v55 = vmax.f32 %v2335_v24, 0.0 }
 0xc2f   :  { %v2411_v40 = vpack.c.bf16 %v2397_v23, %v2396_v25 }
 0xc30   :  { %v2410_v59 = vpack.c.bf16 %v2395_v55, %v2394_v41  ;;  %v4004_v26 = vpop.f32.mrb[68].mxu0 }
 0xc31   :  { %v2356_v27 = vadd.f32 %v4004_v26, %v3236_v21  ;;  %v2347_v28 = vpop.f32.mrb[69].mxu0 }
 0xc32   :  { %v2348_v31 = vadd.f32 %v3236_v21, %v2347_v28  ;;  %v4005_v38 = vpop.f32.mrb[70].mxu0  ;;  %4094 = vmatprep.mubr.bf16.mxu0 %v2410_v59 }
 0xc33   :  { %v2359_v39 = vadd.f32 %v4005_v38, %v3236_v21  ;;  %v2350_v44 = vpop.f32.mrb[71].mxu0  ;;  %4095 = vmatmul.mubr.bf16.vlgmr.msra.gmra.mrb[80].mxu0 %v2411_v40  ;;  %v2400_v61 = vmax.f32 %v2356_v27, 0.0 }
 0xc34   :  { %v2351_v30 = vadd.f32 %v3236_v21, %v2350_v44  ;;  %v2398_v48 = vmax.f32 %v2348_v31, 0.0 }
 0xc35   :  { %v2401_v47 = vmax.f32 %v2359_v39, 0.0 }
 0xc36   :  { %v2399_v51 = vmax.f32 %v2351_v30, 0.0 }
 0xc37   :  { %v2413_v52 = vpack.c.bf16 %v2401_v47, %v2400_v61  ;;  %v5279_v47 = vld [vmem:[%s5364_s19] ss:$0 sm:$0xff] }
 0xc38   :  { %v2412_v0 = vpack.c.bf16 %v2399_v51, %v2398_v48  ;;  %v4008_v53 = vpop.f32.mrb[72].mxu0 }
 0xc39   :  { %v2372_v1 = vadd.f32 %v4008_v53, %v3236_v21  ;;  %v2363_v16 = vpop.f32.mrb[73].mxu0 }
 0xc3a   :  { %v2364_v58 = vadd.f32 %v3236_v21, %v2363_v16  ;;  %v4009_v49 = vpop.f32.mrb[74].mxu0  ;;  %4098 = vmatprep.mubr.bf16.mxu0 %v2412_v0 }
 0xc3b   :  { %v2375_v12 = vadd.f32 %v4009_v49, %v3236_v21  ;;  %v2366_v2 = vpop.f32.mrb[75].mxu0  ;;  %4099 = vmatmul.mubr.bf16.gmra.mrb[84].mxu0 %v2413_v52  ;;  %v2404_v29 = vmax.f32 %v2372_v1, 0.0 }
 0xc3c   :  { %v2367_v11 = vadd.f32 %v3236_v21, %v2366_v2  ;;  %v2402_v33 = vmax.f32 %v2364_v58, 0.0 }
 0xc3d   :  { %v2405_v32 = vmax.f32 %v2375_v12, 0.0 }
 0xc3e   :  { %v2403_v63 = vmax.f32 %v2367_v11, 0.0 }
 0xc3f   :  { %v2415_v62 = vpack.c.bf16 %v2405_v32, %v2404_v29 }
 0xc40   :  { %v2414_v3 = vpack.c.bf16 %v2403_v63, %v2402_v33  ;;  %v4012_v8 = vpop.f32.mrb[76].mxu0 }
 0xc41   :  { %v2388_v9 = vadd.f32 %v4012_v8, %v3236_v21  ;;  %v2379_v10 = vpop.f32.mrb[77].mxu0 }
 0xc42   :  { %v2380_v13 = vadd.f32 %v3236_v21, %v2379_v10  ;;  %v4013_v14 = vpop.f32.mrb[78].mxu0  ;;  %4102 = vmatprep.mubr.bf16.mxu0 %v2414_v3 }
 0xc43   :  { %v2391_v15 = vadd.f32 %v4013_v14, %v3236_v21  ;;  %v2382_v17 = vpop.f32.mrb[79].mxu0  ;;  %4103 = vmatmul.mubr.bf16.gmra.mrb[88].mxu0 %v2415_v62  ;;  %v2408_v46 = vmax.f32 %v2388_v9, 0.0 }
 0xc44   :  { %v2383_v50 = vadd.f32 %v3236_v21, %v2382_v17  ;;  %v2406_v7 = vmax.f32 %v2380_v13, 0.0 }
 0xc45   :  { %v2409_v18 = vmax.f32 %v2391_v15, 0.0 }
 0xc46   :  { %v2407_v19 = vmax.f32 %v2383_v50, 0.0 }
 0xc47   :  { %v2417_v5 = vpack.c.bf16 %v2409_v18, %v2408_v46 }
 0xc48   :  { %v2416_v20 = vpack.c.bf16 %v2407_v19, %v2406_v7 }
 0xc4a   :  { %4106 = vmatprep.mubr.bf16.mxu0 %v2416_v20 }
 0xc4b   :  { %4107 = vmatmul.mubr.bf16.gmra.mrb[92].mxu0 %v2417_v5 }
 0xd06   :  { %v4096_v35 = vpop.f32.mrb[80].mxu0 }
 0xd07   :  { %v2838_v22 = vpop.f32.mrb[81].mxu0 }
 0xd08   :  { %v4097_v34 = vpop.f32.mrb[82].mxu0 }
 0xd09   :  { %v2918_v45 = vpack.c.bf16 %v4097_v34, %v4096_v35  ;;  %v2841_v57 = vpop.f32.mrb[83].mxu0 }
 0xd0a   :  { %v2917_v6 = vpack.c.bf16 %v2841_v57, %v2838_v22 }
 0xd0c   :  { %4110 = vmatprep.subr.bf16.mxu1 %v2917_v6 }
 0xd0d   :  { %4111 = vmatpush3.bf16.msra.mxu1 %v2917_v6 }
 0xd0e   :  { %v4100_v4 = vpop.f32.mrb[84].mxu0  ;;  %4112 = vmatprep.subr.bf16.mxu1 %v2918_v45 }
 0xd0f   :  { %v2854_v24 = vpop.f32.mrb[85].mxu0 }
 0xd10   :  { %v4101_v21 = vpop.f32.mrb[86].mxu0 }
 0xd11   :  { %v2920_v25 = vpack.c.bf16 %v4101_v21, %v4100_v4  ;;  %v2857_v23 = vpop.f32.mrb[87].mxu0  ;;  %4113 = vmatpush3.bf16.msra.mxu1 %v2918_v45 }
 0xd12   :  { %v2919_v41 = vpack.c.bf16 %v2857_v23, %v2854_v24 }
 0xd14   :  { %4114 = vmatprep.subr.bf16.mxu1 %v2919_v41 }
 0xd15   :  { %4115 = vmatpush3.bf16.msra.mxu1 %v2919_v41 }
 0xd16   :  { %v4104_v55 = vpop.f32.mrb[88].mxu0  ;;  %4116 = vmatprep.subr.bf16.mxu1 %v2920_v25 }
 0xd17   :  { %v2870_v40 = vpop.f32.mrb[89].mxu0 }
 0xd18   :  { %v4105_v59 = vpop.f32.mrb[90].mxu0 }
 0xd19   :  { %v2922_v26 = vpack.c.bf16 %v4105_v59, %v4104_v55  ;;  %v2873_v27 = vpop.f32.mrb[91].mxu0  ;;  %4117 = vmatpush3.bf16.msra.mxu1 %v2920_v25 }
 0xd1a   :  { %v2921_v28 = vpack.c.bf16 %v2873_v27, %v2870_v40 }
 0xd1c   :  { %4118 = vmatprep.subr.bf16.mxu1 %v2921_v28 }
 0xd1d   :  { %4119 = vmatpush3.bf16.msra.mxu1 %v2921_v28 }
 0xd1e   :  { %v4108_v31 = vpop.f32.mrb[92].mxu0  ;;  %4120 = vmatprep.subr.bf16.mxu1 %v2922_v26 }
 0xd1f   :  { %v2886_v38 = vpop.f32.mrb[93].mxu0 }
 0xd20   :  { %v4109_v39 = vpop.f32.mrb[94].mxu0 }
 0xd21   :  { %v2924_v44 = vpack.c.bf16 %v4109_v39, %v4108_v31  ;;  %v2889_v30 = vpop.f32.mrb[95].mxu0  ;;  %4121 = vmatpush3.bf16.msra.mxu1 %v2922_v26 }
 0xd22   :  { %v2923_v61 = vpack.c.bf16 %v2889_v30, %v2886_v38 }
 0xd24   :  { %4122 = vmatprep.subr.bf16.mxu1 %v2923_v61 }
 0xd25   :  { %4123 = vmatpush3.bf16.msra.mxu1 %v2923_v61 }
 0xd26   :  { %4124 = vmatprep.subr.bf16.mxu1 %v2924_v44 }
 0xd29   :  { %4125 = vmatpush3.bf16.msra.mxu1 %v2924_v44 }
 0xd2c   :  { %4127 = vmatmul.mubr.bf16.vlgmr.msra.gmra.mrb[112].mxu1 %v5158_v36 }
 0xd2d   :  { %4130 = vmatprep.mubr.bf16.mxu1 %v5164_v37 }
 0xd34   :  { %4131 = vmatmul.mubr.bf16.gmra.mrb[116].mxu1 %v5170_v42 }
 0xd35   :  { %4134 = vmatprep.mubr.bf16.mxu1 %v5176_v43 }
 0xd3c   :  { %4135 = vmatmul.mubr.bf16.gmra.mrb[120].mxu1 %v5182_v54 }
 0xd3d   :  { %4138 = vmatprep.mubr.bf16.mxu1 %v5188_v60 }
 0xd44   :  { %4139 = vmatmul.mubr.bf16.gmra.mrb[124].mxu1 %v5194_v56 }
 0xdff   :  { %v4128_v48 = vpop.f32.mrb[112].mxu1 }
 0xe00   :  { %v2975_v36 = vadd.f32 %v4128_v48, %v5279_v47  ;;  %v2966_v51 = vpop.f32.mrb[113].mxu1 }
 0xe01   :  { %v2967_v37 = vadd.f32 %v5279_v47, %v2966_v51  ;;  %v4129_v42 = vpop.f32.mrb[114].mxu1 }
 0xe02   :  { %v3264_v52 = vmul.f32 -1.442695, %v2975_v36  ;;  %v2978_v43 = vadd.f32 %v4129_v42, %v5279_v47  ;;  %v2969_v54 = vpop.f32.mrb[115].mxu1 }
 0xe03   :  { %v3262_v0 = vmul.f32 -1.442695, %v2967_v37  ;;  %v2970_v60 = vadd.f32 %v5279_v47, %v2969_v54 }
 0xe04   :  { %4322 = vpow2.f32 %v3264_v52  ;;  %v3265_v56 = vmul.f32 -1.442695, %v2978_v43 }
 0xe05   :  { %4324 = vpow2.f32 %v3262_v0  ;;  %v3263_v53 = vmul.f32 -1.442695, %v2970_v60 }
 0xe06   :  { %4326 = vpow2.f32 %v3265_v56 }
 0xe07   :  { %4328 = vpow2.f32 %v3263_v53  ;;  %v4132_v1 = vpop.f32.mrb[116].mxu1 }
 0xe08   :  { %v2991_v16 = vadd.f32 %v4132_v1, %v5279_v47  ;;  %v2982_v58 = vpop.f32.mrb[117].mxu1 }
 0xe09   :  { %v2983_v49 = vadd.f32 %v5279_v47, %v2982_v58  ;;  %v4133_v12 = vpop.f32.mrb[118].mxu1 }
 0xe0a   :  { %v3268_v2 = vmul.f32 -1.442695, %v2991_v16  ;;  %v2994_v11 = vadd.f32 %v4133_v12, %v5279_v47  ;;  %v2985_v29 = vpop.f32.mrb[119].mxu1 }
 0xe0b   :  { %v3266_v32 = vmul.f32 -1.442695, %v2983_v49  ;;  %v2986_v33 = vadd.f32 %v5279_v47, %v2985_v29 }
 0xe0c   :  { %4330 = vpow2.f32 %v3268_v2  ;;  %v3269_v63 = vmul.f32 -1.442695, %v2994_v11 }
 0xe0d   :  { %4332 = vpow2.f32 %v3266_v32  ;;  %v3267_v62 = vmul.f32 -1.442695, %v2986_v33 }
 0xe0e   :  { %v4323_v3 = vpop.eup %4322  ;;  %4334 = vpow2.f32 %v3269_v63 }
 0xe0f   :  { %v4325_v8 = vpop.eup %4324  ;;  %v3079_v9 = vadd.f32 1.0, %v4323_v3  ;;  %4336 = vpow2.f32 %v3267_v62  ;;  %v4136_v10 = vpop.f32.mrb[120].mxu1 }
 0xe10   :  { %v4327_v13 = vpop.eup %4326  ;;  %v3077_v14 = vadd.f32 1.0, %v4325_v8  ;;  %v3007_v15 = vadd.f32 %v4136_v10, %v5279_v47  ;;  %v2998_v17 = vpop.f32.mrb[121].mxu1 }
 0xe11   :  { %v4329_v50 = vpop.eup %4328  ;;  %4338 = vrcp.f32 %v3079_v9  ;;  %v3080_v46 = vadd.f32 1.0, %v4327_v13  ;;  %v2999_v18 = vadd.f32 %v5279_v47, %v2998_v17  ;;  %v4137_v7 = vpop.f32.mrb[122].mxu1 }
 0xe12   :  { %4340 = vrcp.f32 %v3077_v14  ;;  %v3078_v19 = vadd.f32 1.0, %v4329_v50  ;;  %v3272_v5 = vmul.f32 -1.442695, %v3007_v15  ;;  %v3010_v20 = vadd.f32 %v4137_v7, %v5279_v47  ;;  %v3001_v35 = vpop.f32.mrb[123].mxu1 }
 0xe13   :  { %4342 = vrcp.f32 %v3080_v46  ;;  %v3270_v22 = vmul.f32 -1.442695, %v2999_v18  ;;  %v3002_v34 = vadd.f32 %v5279_v47, %v3001_v35 }
 0xe14   :  { %4344 = vrcp.f32 %v3078_v19  ;;  %v3273_v45 = vmul.f32 -1.442695, %v3010_v20 }
 0xe15   :  { %4346 = vpow2.f32 %v3272_v5  ;;  %v3271_v57 = vmul.f32 -1.442695, %v3002_v34 }
 0xe16   :  { %v4331_v6 = vpop.eup %4330  ;;  %4348 = vpow2.f32 %v3270_v22 }
 0xe17   :  { %v4333_v4 = vpop.eup %4332  ;;  %v3083_v24 = vadd.f32 1.0, %v4331_v6  ;;  %4350 = vpow2.f32 %v3273_v45  ;;  %v4140_v21 = vpop.f32.mrb[124].mxu1 }
 0xe18   :  { %v4335_v25 = vpop.eup %4334  ;;  %v3081_v23 = vadd.f32 1.0, %v4333_v4  ;;  %4352 = vpow2.f32 %v3271_v57  ;;  %v3023_v41 = vadd.f32 %v4140_v21, %v5279_v47  ;;  %v3014_v55 = vpop.f32.mrb[125].mxu1 }
 0xe19   :  { %v4337_v40 = vpop.eup %4336  ;;  %4354 = vrcp.f32 %v3083_v24  ;;  %v3084_v59 = vadd.f32 1.0, %v4335_v25  ;;  %v3015_v26 = vadd.f32 %v5279_v47, %v3014_v55  ;;  %v4141_v27 = vpop.f32.mrb[126].mxu1 }
 0xe1a   :  { %4356 = vrcp.f32 %v3081_v23  ;;  %v3082_v28 = vadd.f32 1.0, %v4337_v40  ;;  %v3276_v31 = vmul.f32 -1.442695, %v3023_v41  ;;  %v3026_v38 = vadd.f32 %v4141_v27, %v5279_v47  ;;  %v3017_v39 = vpop.f32.mrb[127].mxu1 }
 0xe1b   :  { %v4339_v44 = vpop.eup %4338  ;;  %4358 = vrcp.f32 %v3084_v59  ;;  %v3274_v30 = vmul.f32 -1.442695, %v3015_v26  ;;  %v3018_v61 = vadd.f32 %v5279_v47, %v3017_v39 }
 0xe1c   :  { %v4341_v48 = vpop.eup %4340  ;;  %3127 = vst [vmem:[%s5383_s27 + $0x10] sm:$0xff] %v4339_v44  ;;  %4360 = vrcp.f32 %v3082_v28  ;;  %v3277_v36 = vmul.f32 -1.442695, %v3026_v38 }
 0xe1d   :  { %v4343_v51 = vpop.eup %4342  ;;  %3125 = vst [vmem:[%s5383_s27] sm:$0xff] %v4341_v48  ;;  %4362 = vpow2.f32 %v3276_v31  ;;  %v3275_v37 = vmul.f32 -1.442695, %v3018_v61 }
 0xe1e   :  { %v4345_v42 = vpop.eup %4344  ;;  %3128 = vst [vmem:[%s5383_s27 + $0x18] sm:$0xff] %v4343_v51  ;;  %4364 = vpow2.f32 %v3274_v30 }
 0xe1f   :  { %v4347_v47 = vpop.eup %4346  ;;  %3126 = vst [vmem:[%s5383_s27 + $0x8] sm:$0xff] %v4345_v42  ;;  %4366 = vpow2.f32 %v3277_v36 }
 0xe20   :  { %v4349_v52 = vpop.eup %4348  ;;  %v3087_v43 = vadd.f32 1.0, %v4347_v47  ;;  %4368 = vpow2.f32 %v3275_v37 }
 0xe21   :  { %v4351_v54 = vpop.eup %4350  ;;  %v3085_v0 = vadd.f32 1.0, %v4349_v52 }
 0xe22   :  { %v4353_v60 = vpop.eup %4352  ;;  %4370 = vrcp.f32 %v3087_v43  ;;  %v3088_v56 = vadd.f32 1.0, %v4351_v54 }
 0xe23   :  { %v4355_v53 = vpop.eup %4354  ;;  %4372 = vrcp.f32 %v3085_v0  ;;  %v3086_v1 = vadd.f32 1.0, %v4353_v60 }
 0xe24   :  { %v4357_v16 = vpop.eup %4356  ;;  %3131 = vst [vmem:[%s5383_s27 + $0x30] sm:$0xff] %v4355_v53  ;;  %4374 = vrcp.f32 %v3088_v56 }
 0xe25   :  { %v4359_v58 = vpop.eup %4358  ;;  %3129 = vst [vmem:[%s5383_s27 + $0x20] sm:$0xff] %v4357_v16  ;;  %4376 = vrcp.f32 %v3086_v1 }
 0xe26   :  { %v4361_v49 = vpop.eup %4360  ;;  %3132 = vst [vmem:[%s5383_s27 + $0x38] sm:$0xff] %v4359_v58 }
 0xe27   :  { %v4363_v12 = vpop.eup %4362  ;;  %3130 = vst [vmem:[%s5383_s27 + $0x28] sm:$0xff] %v4361_v49 }
 0xe28   :  { %v4365_v2 = vpop.eup %4364  ;;  %v3091_v11 = vadd.f32 1.0, %v4363_v12 }
 0xe29   :  { %v4367_v29 = vpop.eup %4366  ;;  %v3089_v32 = vadd.f32 1.0, %v4365_v2 }
 0xe2a   :  { %v4369_v33 = vpop.eup %4368  ;;  %4378 = vrcp.f32 %v3091_v11  ;;  %v3092_v63 = vadd.f32 1.0, %v4367_v29 }
 0xe2b   :  { %4380 = vrcp.f32 %v3089_v32  ;;  %v3090_v62 = vadd.f32 1.0, %v4369_v33 }
 0xe2c   :  { %v4371_v3 = vpop.eup %4370  ;;  %4382 = vrcp.f32 %v3092_v63 }
 0xe2d   :  { %v4373_v8 = vpop.eup %4372  ;;  %3135 = vst [vmem:[%s5383_s27 + $0x50] sm:$0xff] %v4371_v3  ;;  %4384 = vrcp.f32 %v3090_v62 }
 0xe2e   :  { %v4375_v9 = vpop.eup %4374  ;;  %3133 = vst [vmem:[%s5383_s27 + $0x40] sm:$0xff] %v4373_v8 }
 0xe2f   :  { %v4377_v10 = vpop.eup %4376  ;;  %3136 = vst [vmem:[%s5383_s27 + $0x58] sm:$0xff] %v4375_v9 }
 0xe30   :  { %3134 = vst [vmem:[%s5383_s27 + $0x48] sm:$0xff] %v4377_v10 }
 0xe34   :  { %v4379_v13 = vpop.eup %4378 }
 0xe35   :  { %v4381_v14 = vpop.eup %4380  ;;  %3139 = vst [vmem:[%s5383_s27 + $0x70] sm:$0xff] %v4379_v13 }
 0xe36   :  { %v4383_v15 = vpop.eup %4382  ;;  %3137 = vst [vmem:[%s5383_s27 + $0x60] sm:$0xff] %v4381_v14 }
 0xe37   :  { %v4385_v17 = vpop.eup %4384  ;;  %3140 = vst [vmem:[%s5383_s27 + $0x78] sm:$0xff] %v4383_v15 }
 0xe38   :  { %3138 = vst [vmem:[%s5383_s27 + $0x68] sm:$0xff] %v4385_v17 }
 0xe39   :  { %3145 = vsyncpa [#allocation3], 1 }
 0xe3a   :  { %3146 = vsyncpa [#allocation5], 1 }
 0xe3b   :  { %3147 = vsyncpa [#allocation8], 1 }
 0xe3c   :  { %3148 = vsyncpa [#allocation11], 1 }
 0xe3d   :  { %3149 = vsyncpa [#allocation14], 1 }
 0xe3e   :  { %3150 = vsyncpa [#allocation17], 1 }

</bundles_post_ra>
